<compile_context>
chip_gen: v7x
topology: tpu7x:2x2x1
jax: 0.10.0
libtpu: 0.0.40
codegen_flags: <defaults>
</compile_context>

<pallas_src>
import functools

import jax
import jax.numpy as jnp
from jax import lax
from jax.experimental import pallas as pl
from jax.experimental.pallas import tpu as pltpu


def _fused_kernel(block_n, H, W, Cin, Cout, compute_dtype,
                  x_ref, ml_ref, mr_ref, w1_ref, w23_ref, b1_ref, b23_ref, o_ref):
    """One grid step processes block_n images, channels-first / lane-dense.

    x_ref  : (block_n, Cin, Lp) f32   row-padded, flattened, +1 zero guard each end
                                      (Lp = (H+2)*W + 2)
    ml_ref : (1, H*W) f32             0 at flat positions with x == 0, else 1
    mr_ref : (1, H*W) f32             0 at flat positions with x == W-1, else 1
    w1_ref : (Cin, 9*Cin)  cdt        conv1 im2col weights (BN1 scale folded in)
    w23_ref: (Cout, 9*Cin) cdt        conv2*BN2*conv3*BN3 folded im2col weights
    b1_ref : (Cin, 1)  f32            folded BN1 bias
    b23_ref: (Cout, 1) f32            folded BN2/BN3 bias
    o_ref  : (block_n, Cout, H*W)     lane-dense output block (NC,flat layout)
    """
    f32 = jnp.float32
    L = H * W                                   # valid output positions per image
    mask_l = ml_ref[...]
    mask_r = mr_ref[...]
    w1 = w1_ref[...]
    w23 = w23_ref[...]
    b1 = b1_ref[...]
    b23 = b23_ref[...]

    def im2col(buf):
        # buf: (C, Lp) row-padded flat image (f32).  Tap (u, v) of the 3x3 window
        # is the lane-offset slice starting at u*W + v.  Left/right image borders
        # are handled with 0/1 masks (the flat layout wraps across rows there);
        # top/bottom borders are real zero rows already present in `buf`.
        cols = []
        for u in range(3):
            for v in range(3):
                d = u * W + v
                s = buf[:, d:d + L]
                if v == 0:
                    s = s * mask_l
                elif v == 2:
                    s = s * mask_r
                cols.append(s)
        return jnp.concatenate(cols, axis=0)    # (9*C, L)

    zp = jnp.zeros((Cin, W + 1), f32)           # row pad + guard for the 2nd conv

    for n in range(block_n):                    # static unroll over the image block
        x_img = x_ref[n]                        # (Cin, Lp) f32

        # ---- conv1 (3x3, BN1 scale folded into weights) + bias + ReLU ----
        p1 = im2col(x_img).astype(compute_dtype)
        f1 = jnp.dot(w1, p1, preferred_element_type=f32) + b1      # (Cin, L)
        f1 = jnp.maximum(f1, 0.0)

        # ---- re-pad rows (zeros) so the same im2col works for the 2nd conv ----
        f1p = jnp.concatenate([zp, f1, zp], axis=1)                # (Cin, Lp)

        # ---- fused conv2(3x3) ∘ BN2 ∘ conv3(1x1) ∘ BN3 : single matmul ----
        p2 = im2col(f1p).astype(compute_dtype)
        f23 = jnp.dot(w23, p2, preferred_element_type=f32) + b23   # (Cout, L)

        # ---- residual (f32 interior slice of the padded input) + ReLU ----
        res = x_img[:, W + 1:W + 1 + L]                            # (Cin, L)
        o_ref[n] = jnp.maximum(f23 + res, 0.0).astype(o_ref.dtype)


def _fold_bn(gamma, beta, mean, var, eps=1e-5):
    scale = gamma / jnp.sqrt(var + eps)
    return scale, beta - mean * scale


def _prepare_weights(w1_oihw, w2_oihw, w3_oihw, bn1, bn2, bn3, compute_dtype):
    """im2col weights with BN scales folded in and conv2+BN2 folded into conv3+BN3.

    Exact in f32 (no nonlinearity between BN2 and conv3 in FuseMBlayer1).
    Returns (w1m (Cin,9Cin), w23m (Cout,9Cin)) in compute_dtype and
    (b1 (Cin,1), b23 (Cout,1)) in f32.  im2col column order: (ky*3+kx)*Cin + cin.
    """
    f32 = jnp.float32
    Cin = w1_oihw.shape[0]
    Cmid = w2_oihw.shape[0]
    Cout = w3_oihw.shape[0]
    (s1, b1), (s2, b2), (s3, b3) = bn1, bn2, bn3

    w1m = jnp.transpose(w1_oihw, (0, 2, 3, 1)).reshape(Cin, 9 * Cin).astype(f32)
    w1m = s1[:, None] * w1m
    w2m = jnp.transpose(w2_oihw, (0, 2, 3, 1)).reshape(Cmid, 9 * Cin).astype(f32)
    w3m = w3_oihw[:, :, 0, 0].astype(f32)                           # (Cout, Cmid)

    w23m = (s3[:, None] * w3m) @ (s2[:, None] * w2m)                # (Cout, 9*Cin)
    b23 = s3 * (w3m @ b2) + b3                                      # (Cout,)

    return (w1m.astype(compute_dtype), w23m.astype(compute_dtype),
            b1.reshape(Cin, 1).astype(f32), b23.reshape(Cout, 1).astype(f32))


def fuse_mb_layer1(x_nchw, w1_oihw, w2_oihw, w3_oihw, bn1, bn2, bn3,
                   *, block_n=2, compute_dtype=jnp.bfloat16):
    """Fused FuseMBlayer1 forward (eval-mode BN).  x_nchw: (N, Cin, H, W) f32."""
    N, Cin, H, W = x_nchw.shape
    Cout = w3_oihw.shape[0]
    assert Cout == Cin, "residual add requires out_chan == in_chan"
    f32 = jnp.float32
    L = H * W
    Lp = (H + 2) * W + 2

    # block_n: divide N, and keep the parallel grid length >= 2 (v7x has 2 TCs).
    block_n = max(1, min(block_n, N))
    while N % block_n:
        block_n -= 1
    if N >= 2 and N // block_n < 2:
        block_n = next(b for b in range(N // 2, 0, -1) if N % b == 0)

    # ---- activations: row-pad, flatten spatial, +1 zero guard element each end ----
    xp = jnp.pad(x_nchw, ((0, 0), (0, 0), (1, 1), (0, 0)))          # (N, Cin, H+2, W)
    x_flat = jnp.pad(xp.reshape(N, Cin, (H + 2) * W), ((0, 0), (0, 0), (1, 1)))

    # ---- left/right border masks over flat output positions ----
    col = jnp.arange(L, dtype=jnp.int32) % W
    mask_l = (col != 0).astype(f32).reshape(1, L)
    mask_r = (col != W - 1).astype(f32).reshape(1, L)

    # ---- folded weights (f32 fold, then cast to the MXU operand dtype) ----
    w1m, w23m, b1v, b23v = _prepare_weights(
        w1_oihw, w2_oihw, w3_oihw, bn1, bn2, bn3, compute_dtype)

    kernel = functools.partial(_fused_kernel, block_n, H, W, Cin, Cout,
                               compute_dtype)

    # VMEM budget: double-buffered input/output blocks + weights/masks + headroom.
    xblk = block_n * Cin * Lp * 4
    oblk = block_n * Cout * L * 4
    vmem_limit = int(min(64 << 20, max(16 << 20, 4 * (xblk + oblk) + (4 << 20))))

    grid_spec = pltpu.PrefetchScalarGridSpec(
        num_scalar_prefetch=0,
        grid=(N // block_n,),
        in_specs=[
            pl.BlockSpec((block_n, Cin, Lp), lambda n: (n, 0, 0)),
            pl.BlockSpec((1, L), lambda n: (0, 0)),
            pl.BlockSpec((1, L), lambda n: (0, 0)),
            pl.BlockSpec((Cin, 9 * Cin), lambda n: (0, 0)),
            pl.BlockSpec((Cout, 9 * Cin), lambda n: (0, 0)),
            pl.BlockSpec((Cin, 1), lambda n: (0, 0)),
            pl.BlockSpec((Cout, 1), lambda n: (0, 0)),
        ],
        out_specs=pl.BlockSpec((block_n, Cout, L), lambda n: (n, 0, 0)),
        scratch_shapes=[],
    )

    out_flat = pl.pallas_call(
        kernel,
        grid_spec=grid_spec,
        out_shape=jax.ShapeDtypeStruct((N, Cout, L), x_nchw.dtype),
        compiler_params=pltpu.CompilerParams(
            dimension_semantics=("parallel",),      # batch axis: megacore / v7x
            vmem_limit_bytes=vmem_limit),
    )(x_flat, mask_l, mask_r, w1m, w23m, b1v, b23v)

    # (N, Cout, H*W) -> NCHW is a free, contiguous reshape (no transpose).
    return out_flat.reshape(N, Cout, H, W)


# ----------------------------- references / test -----------------------------

def _conv_nchw(x, w, pad):
    return lax.conv_general_dilated(
        x, w, window_strides=(1, 1), padding=[(pad, pad), (pad, pad)],
        dimension_numbers=('NCHW', 'OIHW', 'NCHW'),
        preferred_element_type=jnp.float32)


def _ref_forward(x, w1, w2, w3, bn1, bn2, bn3):
    """Pure-JAX f32 reference with the module's unfused structure (eval-mode BN)."""
    def bn(y, sb):
        s, b = sb
        return y * s[None, :, None, None] + b[None, :, None, None]
    f = jnp.maximum(bn(_conv_nchw(x, w1, 1), bn1), 0.0)   # conv1 + BN + ReLU
    f = bn(_conv_nchw(f, w2, 1), bn2)                     # conv2 + BN
    f = bn(_conv_nchw(f, w3, 0), bn3)                     # conv3 (1x1) + BN
    return jnp.maximum(f + x, 0.0)                        # residual + ReLU


def _ref_forward_folded(x, w1m_q, b1, w23m_q, b23):
    """Reference mirroring the kernel's exact math: folded + quantized conv
    weights, f32 accumulation / bias / residual.  Used for the tight check."""
    Cin = x.shape[1]
    Cout = w23m_q.shape[0]
    cdt = w1m_q.dtype
    k1 = jnp.transpose(w1m_q.reshape(Cin, 3, 3, Cin), (0, 3, 1, 2))
    k23 = jnp.transpose(w23m_q.reshape(Cout, 3, 3, Cin), (0, 3, 1, 2))
    f1 = jnp.maximum(_conv_nchw(x.astype(cdt), k1, 1)
                     + b1.reshape(1, -1, 1, 1), 0.0)
    f23 = _conv_nchw(f1.astype(cdt), k23, 1) + b23.reshape(1, -1, 1, 1)
    return jnp.maximum(f23 + x, 0.0)


if __name__ == "__main__":
    key = jax.random.PRNGKey(0)
    N, Cin, H, W = 4, 4, 16, 16
    exp_ratio = 6
    Cmid, Cout = Cin * exp_ratio, Cin   # residual requires out_chan == in_chan

    ks = jax.random.split(key, 8)
    x = jax.random.normal(ks[0], (N, Cin, H, W), jnp.float32)
    w1 = jax.random.normal(ks[1], (Cin, Cin, 3, 3), jnp.float32) * 0.2
    w2 = jax.random.normal(ks[2], (Cmid, Cin, 3, 3), jnp.float32) * 0.2
    w3 = jax.random.normal(ks[3], (Cout, Cmid, 1, 1), jnp.float32) * 0.2

    def bn_params(k, C):
        k1, k2, k3, k4 = jax.random.split(k, 4)
        gamma = 1.0 + 0.1 * jax.random.normal(k1, (C,), jnp.float32)
        beta = 0.1 * jax.random.normal(k2, (C,), jnp.float32)
        mean = 0.1 * jax.random.normal(k3, (C,), jnp.float32)
        var = jnp.abs(jax.random.normal(k4, (C,), jnp.float32)) + 0.5
        return gamma, beta, mean, var

    bn1 = _fold_bn(*bn_params(ks[4], Cin))
    bn2 = _fold_bn(*bn_params(ks[5], Cmid))
    bn3 = _fold_bn(*bn_params(ks[6], Cout))

    out = fuse_mb_layer1(x, w1, w2, w3, bn1, bn2, bn3,
                         block_n=2, compute_dtype=jnp.bfloat16)
    out = jax.block_until_ready(out)

    # Tight check: reference using exactly the kernel's folded / bf16-quantized
    # weights (f32 accumulation), i.e. the same math up to summation order.
    w1m_q, w23m_q, b1v, b23v = _prepare_weights(w1, w2, w3, bn1, bn2, bn3,
                                                jnp.bfloat16)
    ref_q = _ref_forward_folded(x, w1m_q, b1v, w23m_q, b23v)
    err_q = float(jnp.max(jnp.abs(out - ref_q)))
    assert jnp.allclose(out, ref_q, atol=1e-2, rtol=1e-2), err_q

    # Loose sanity check vs the full-f32 unfused module semantics (bf16 MXU operands).
    ref_f32 = _ref_forward(x, w1, w2, w3, bn1, bn2, bn3)
    err_f32 = float(jnp.max(jnp.abs(out - ref_f32)))
    assert err_f32 < 0.2, err_f32

    print("KERNEL_OK")
</pallas_src>

<mosaic_0001>
module attributes {stable_mosaic.version = 11 : i64} {
  func.func @_fused_kernel(%arg0: i32, %arg1: memref<2x4x290xf32, #tpu.memory_space<vmem>>, %arg2: memref<1x256xf32, #tpu.memory_space<vmem>>, %arg3: memref<1x256xf32, #tpu.memory_space<vmem>>, %arg4: memref<4x36xbf16, #tpu.memory_space<vmem>>, %arg5: memref<4x36xbf16, #tpu.memory_space<vmem>>, %arg6: memref<4x1xf32, #tpu.memory_space<vmem>>, %arg7: memref<4x1xf32, #tpu.memory_space<vmem>>, %arg8: memref<2x4x256xf32, #tpu.memory_space<vmem>>) attributes {dimension_semantics = [#tpu.dimension_semantics<parallel>], iteration_bounds = array<i64: 2>, scalar_prefetch = 0 : i64, scratch_operands = 0 : i64, tpu.core_type = #tpu.core_type<tc>, window_params = [{transform_indices = @transform_0, window_bounds = array<i64: 2, 4, 290>}, {pipeline_mode = #tpu.pipeline_mode<synchronous>, transform_indices = @transform_1, window_bounds = array<i64: 1, 256>}, {pipeline_mode = #tpu.pipeline_mode<synchronous>, transform_indices = @transform_2, window_bounds = array<i64: 1, 256>}, {pipeline_mode = #tpu.pipeline_mode<synchronous>, transform_indices = @transform_3, window_bounds = array<i64: 4, 36>}, {pipeline_mode = #tpu.pipeline_mode<synchronous>, transform_indices = @transform_4, window_bounds = array<i64: 4, 36>}, {pipeline_mode = #tpu.pipeline_mode<synchronous>, transform_indices = @transform_5, window_bounds = array<i64: 4, 1>}, {pipeline_mode = #tpu.pipeline_mode<synchronous>, transform_indices = @transform_6, window_bounds = array<i64: 4, 1>}, {transform_indices = @transform_7, window_bounds = array<i64: 2, 4, 256>}]} {
    %c0 = arith.constant 0 : index
    %c0_0 = arith.constant 0 : index
    %0 = vector.load %arg2[%c0, %c0_0] : memref<1x256xf32, #tpu.memory_space<vmem>>, vector<1x256xf32>
    %c0_1 = arith.constant 0 : index
    %c0_2 = arith.constant 0 : index
    %1 = vector.load %arg3[%c0_1, %c0_2] : memref<1x256xf32, #tpu.memory_space<vmem>>, vector<1x256xf32>
    %c0_3 = arith.constant 0 : index
    %c0_4 = arith.constant 0 : index
    %2 = vector.load %arg4[%c0_3, %c0_4] : memref<4x36xbf16, #tpu.memory_space<vmem>>, vector<4x36xbf16>
    %c0_5 = arith.constant 0 : index
    %c0_6 = arith.constant 0 : index
    %3 = vector.load %arg5[%c0_5, %c0_6] : memref<4x36xbf16, #tpu.memory_space<vmem>>, vector<4x36xbf16>
    %c0_7 = arith.constant 0 : index
    %c0_8 = arith.constant 0 : index
    %4 = vector.load %arg6[%c0_7, %c0_8] : memref<4x1xf32, #tpu.memory_space<vmem>>, vector<4x1xf32>
    %c0_9 = arith.constant 0 : index
    %c0_10 = arith.constant 0 : index
    %5 = vector.load %arg7[%c0_9, %c0_10] : memref<4x1xf32, #tpu.memory_space<vmem>>, vector<4x1xf32>
    %cst = arith.constant 0.000000e+00 : f32
    %6 = vector.broadcast %cst : f32 to vector<4x17xf32>
    %c0_11 = arith.constant 0 : index
    %c0_12 = arith.constant 0 : index
    %c0_13 = arith.constant 0 : index
    %7 = vector.load %arg1[%c0_11, %c0_12, %c0_13] : memref<2x4x290xf32, #tpu.memory_space<vmem>>, vector<1x4x290xf32>
    %8 = vector.shape_cast %7 : vector<1x4x290xf32> to vector<4x290xf32>
    %9 = vector.extract_strided_slice %8 {offsets = [0, 0], sizes = [4, 256], strides = [1, 1]} : vector<4x290xf32> to vector<4x256xf32>
    %10 = vector.broadcast %0 : vector<1x256xf32> to vector<4x256xf32>
    %11 = arith.mulf %9, %10 : vector<4x256xf32>
    %12 = vector.extract_strided_slice %8 {offsets = [0, 1], sizes = [4, 256], strides = [1, 1]} : vector<4x290xf32> to vector<4x256xf32>
    %13 = vector.extract_strided_slice %8 {offsets = [0, 2], sizes = [4, 256], strides = [1, 1]} : vector<4x290xf32> to vector<4x256xf32>
    %14 = vector.broadcast %1 : vector<1x256xf32> to vector<4x256xf32>
    %15 = arith.mulf %13, %14 : vector<4x256xf32>
    %16 = vector.extract_strided_slice %8 {offsets = [0, 16], sizes = [4, 256], strides = [1, 1]} : vector<4x290xf32> to vector<4x256xf32>
    %17 = vector.broadcast %0 : vector<1x256xf32> to vector<4x256xf32>
    %18 = arith.mulf %16, %17 : vector<4x256xf32>
    %19 = vector.extract_strided_slice %8 {offsets = [0, 17], sizes = [4, 256], strides = [1, 1]} : vector<4x290xf32> to vector<4x256xf32>
    %20 = vector.extract_strided_slice %8 {offsets = [0, 18], sizes = [4, 256], strides = [1, 1]} : vector<4x290xf32> to vector<4x256xf32>
    %21 = vector.broadcast %1 : vector<1x256xf32> to vector<4x256xf32>
    %22 = arith.mulf %20, %21 : vector<4x256xf32>
    %23 = vector.extract_strided_slice %8 {offsets = [0, 32], sizes = [4, 256], strides = [1, 1]} : vector<4x290xf32> to vector<4x256xf32>
    %24 = vector.broadcast %0 : vector<1x256xf32> to vector<4x256xf32>
    %25 = arith.mulf %23, %24 : vector<4x256xf32>
    %26 = vector.extract_strided_slice %8 {offsets = [0, 33], sizes = [4, 256], strides = [1, 1]} : vector<4x290xf32> to vector<4x256xf32>
    %27 = vector.extract_strided_slice %8 {offsets = [0, 34], sizes = [4, 256], strides = [1, 1]} : vector<4x290xf32> to vector<4x256xf32>
    %28 = vector.broadcast %1 : vector<1x256xf32> to vector<4x256xf32>
    %29 = arith.mulf %27, %28 : vector<4x256xf32>
    %30 = tpu.concatenate %11, %12, %15, %18, %19, %22, %25, %26, %29 in 0 : vector<4x256xf32>, vector<4x256xf32>, vector<4x256xf32>, vector<4x256xf32>, vector<4x256xf32>, vector<4x256xf32>, vector<4x256xf32>, vector<4x256xf32>, vector<4x256xf32> -> vector<36x256xf32>
    %31 = arith.truncf %30 : vector<36x256xf32> to vector<36x256xbf16>
    %cst_14 = arith.constant dense<0.000000e+00> : vector<4x256xf32>
    %32 = tpu.matmul %2, %31, %cst_14 {dimension_numbers = #tpu.dot_dimension_numbers<[1], [0], [0], [1], [0, 0, 1, 1], [], []>} : vector<4x36xbf16>, vector<36x256xbf16>, vector<4x256xf32> -> vector<4x256xf32>
    %33 = vector.broadcast %4 : vector<4x1xf32> to vector<4x256xf32>
    %34 = arith.addf %32, %33 : vector<4x256xf32>
    %cst_15 = arith.constant 0.000000e+00 : f32
    %35 = vector.broadcast %cst_15 : f32 to vector<4x256xf32>
    %36 = arith.maximumf %34, %35 : vector<4x256xf32>
    %37 = tpu.concatenate %6, %36, %6 in 1 : vector<4x17xf32>, vector<4x256xf32>, vector<4x17xf32> -> vector<4x290xf32>
    %38 = vector.extract_strided_slice %37 {offsets = [0, 0], sizes = [4, 256], strides = [1, 1]} : vector<4x290xf32> to vector<4x256xf32>
    %39 = vector.broadcast %0 : vector<1x256xf32> to vector<4x256xf32>
    %40 = arith.mulf %38, %39 : vector<4x256xf32>
    %41 = vector.extract_strided_slice %37 {offsets = [0, 1], sizes = [4, 256], strides = [1, 1]} : vector<4x290xf32> to vector<4x256xf32>
    %42 = vector.extract_strided_slice %37 {offsets = [0, 2], sizes = [4, 256], strides = [1, 1]} : vector<4x290xf32> to vector<4x256xf32>
    %43 = vector.broadcast %1 : vector<1x256xf32> to vector<4x256xf32>
    %44 = arith.mulf %42, %43 : vector<4x256xf32>
    %45 = vector.extract_strided_slice %37 {offsets = [0, 16], sizes = [4, 256], strides = [1, 1]} : vector<4x290xf32> to vector<4x256xf32>
    %46 = vector.broadcast %0 : vector<1x256xf32> to vector<4x256xf32>
    %47 = arith.mulf %45, %46 : vector<4x256xf32>
    %48 = vector.extract_strided_slice %37 {offsets = [0, 17], sizes = [4, 256], strides = [1, 1]} : vector<4x290xf32> to vector<4x256xf32>
    %49 = vector.extract_strided_slice %37 {offsets = [0, 18], sizes = [4, 256], strides = [1, 1]} : vector<4x290xf32> to vector<4x256xf32>
    %50 = vector.broadcast %1 : vector<1x256xf32> to vector<4x256xf32>
    %51 = arith.mulf %49, %50 : vector<4x256xf32>
    %52 = vector.extract_strided_slice %37 {offsets = [0, 32], sizes = [4, 256], strides = [1, 1]} : vector<4x290xf32> to vector<4x256xf32>
    %53 = vector.broadcast %0 : vector<1x256xf32> to vector<4x256xf32>
    %54 = arith.mulf %52, %53 : vector<4x256xf32>
    %55 = vector.extract_strided_slice %37 {offsets = [0, 33], sizes = [4, 256], strides = [1, 1]} : vector<4x290xf32> to vector<4x256xf32>
    %56 = vector.extract_strided_slice %37 {offsets = [0, 34], sizes = [4, 256], strides = [1, 1]} : vector<4x290xf32> to vector<4x256xf32>
    %57 = vector.broadcast %1 : vector<1x256xf32> to vector<4x256xf32>
    %58 = arith.mulf %56, %57 : vector<4x256xf32>
    %59 = tpu.concatenate %40, %41, %44, %47, %48, %51, %54, %55, %58 in 0 : vector<4x256xf32>, vector<4x256xf32>, vector<4x256xf32>, vector<4x256xf32>, vector<4x256xf32>, vector<4x256xf32>, vector<4x256xf32>, vector<4x256xf32>, vector<4x256xf32> -> vector<36x256xf32>
    %60 = arith.truncf %59 : vector<36x256xf32> to vector<36x256xbf16>
    %cst_16 = arith.constant dense<0.000000e+00> : vector<4x256xf32>
    %61 = tpu.matmul %3, %60, %cst_16 {dimension_numbers = #tpu.dot_dimension_numbers<[1], [0], [0], [1], [0, 0, 1, 1], [], []>} : vector<4x36xbf16>, vector<36x256xbf16>, vector<4x256xf32> -> vector<4x256xf32>
    %62 = vector.broadcast %5 : vector<4x1xf32> to vector<4x256xf32>
    %63 = arith.addf %61, %62 : vector<4x256xf32>
    %64 = vector.extract_strided_slice %8 {offsets = [0, 17], sizes = [4, 256], strides = [1, 1]} : vector<4x290xf32> to vector<4x256xf32>
    %65 = arith.addf %63, %64 : vector<4x256xf32>
    %cst_17 = arith.constant 0.000000e+00 : f32
    %66 = vector.broadcast %cst_17 : f32 to vector<4x256xf32>
    %67 = arith.maximumf %65, %66 : vector<4x256xf32>
    %c0_18 = arith.constant 0 : index
    %c0_19 = arith.constant 0 : index
    %c0_20 = arith.constant 0 : index
    %68 = vector.load %arg8[%c0_18, %c0_19, %c0_20] : memref<2x4x256xf32, #tpu.memory_space<vmem>>, vector<1x4x256xf32>
    %69 = vector.shape_cast %68 : vector<1x4x256xf32> to vector<4x256xf32>
    %70 = vector.shape_cast %67 : vector<4x256xf32> to vector<1x4x256xf32>
    tpu.vector_store %arg8[%c0_18, %c0_19, %c0_20], %70 {strides = array<i32>} : memref<2x4x256xf32, #tpu.memory_space<vmem>>, vector<1x4x256xf32>,
    %c1 = arith.constant 1 : index
    %c0_21 = arith.constant 0 : index
    %c0_22 = arith.constant 0 : index
    %71 = vector.load %arg1[%c1, %c0_21, %c0_22] : memref<2x4x290xf32, #tpu.memory_space<vmem>>, vector<1x4x290xf32>
    %72 = vector.shape_cast %71 : vector<1x4x290xf32> to vector<4x290xf32>
    %73 = vector.extract_strided_slice %72 {offsets = [0, 0], sizes = [4, 256], strides = [1, 1]} : vector<4x290xf32> to vector<4x256xf32>
    %74 = vector.broadcast %0 : vector<1x256xf32> to vector<4x256xf32>
    %75 = arith.mulf %73, %74 : vector<4x256xf32>
    %76 = vector.extract_strided_slice %72 {offsets = [0, 1], sizes = [4, 256], strides = [1, 1]} : vector<4x290xf32> to vector<4x256xf32>
    %77 = vector.extract_strided_slice %72 {offsets = [0, 2], sizes = [4, 256], strides = [1, 1]} : vector<4x290xf32> to vector<4x256xf32>
    %78 = vector.broadcast %1 : vector<1x256xf32> to vector<4x256xf32>
    %79 = arith.mulf %77, %78 : vector<4x256xf32>
    %80 = vector.extract_strided_slice %72 {offsets = [0, 16], sizes = [4, 256], strides = [1, 1]} : vector<4x290xf32> to vector<4x256xf32>
    %81 = vector.broadcast %0 : vector<1x256xf32> to vector<4x256xf32>
    %82 = arith.mulf %80, %81 : vector<4x256xf32>
    %83 = vector.extract_strided_slice %72 {offsets = [0, 17], sizes = [4, 256], strides = [1, 1]} : vector<4x290xf32> to vector<4x256xf32>
    %84 = vector.extract_strided_slice %72 {offsets = [0, 18], sizes = [4, 256], strides = [1, 1]} : vector<4x290xf32> to vector<4x256xf32>
    %85 = vector.broadcast %1 : vector<1x256xf32> to vector<4x256xf32>
    %86 = arith.mulf %84, %85 : vector<4x256xf32>
    %87 = vector.extract_strided_slice %72 {offsets = [0, 32], sizes = [4, 256], strides = [1, 1]} : vector<4x290xf32> to vector<4x256xf32>
    %88 = vector.broadcast %0 : vector<1x256xf32> to vector<4x256xf32>
    %89 = arith.mulf %87, %88 : vector<4x256xf32>
    %90 = vector.extract_strided_slice %72 {offsets = [0, 33], sizes = [4, 256], strides = [1, 1]} : vector<4x290xf32> to vector<4x256xf32>
    %91 = vector.extract_strided_slice %72 {offsets = [0, 34], sizes = [4, 256], strides = [1, 1]} : vector<4x290xf32> to vector<4x256xf32>
    %92 = vector.broadcast %1 : vector<1x256xf32> to vector<4x256xf32>
    %93 = arith.mulf %91, %92 : vector<4x256xf32>
    %94 = tpu.concatenate %75, %76, %79, %82, %83, %86, %89, %90, %93 in 0 : vector<4x256xf32>, vector<4x256xf32>, vector<4x256xf32>, vector<4x256xf32>, vector<4x256xf32>, vector<4x256xf32>, vector<4x256xf32>, vector<4x256xf32>, vector<4x256xf32> -> vector<36x256xf32>
    %95 = arith.truncf %94 : vector<36x256xf32> to vector<36x256xbf16>
    %cst_23 = arith.constant dense<0.000000e+00> : vector<4x256xf32>
    %96 = tpu.matmul %2, %95, %cst_23 {dimension_numbers = #tpu.dot_dimension_numbers<[1], [0], [0], [1], [0, 0, 1, 1], [], []>} : vector<4x36xbf16>, vector<36x256xbf16>, vector<4x256xf32> -> vector<4x256xf32>
    %97 = vector.broadcast %4 : vector<4x1xf32> to vector<4x256xf32>
    %98 = arith.addf %96, %97 : vector<4x256xf32>
    %cst_24 = arith.constant 0.000000e+00 : f32
    %99 = vector.broadcast %cst_24 : f32 to vector<4x256xf32>
    %100 = arith.maximumf %98, %99 : vector<4x256xf32>
    %101 = tpu.concatenate %6, %100, %6 in 1 : vector<4x17xf32>, vector<4x256xf32>, vector<4x17xf32> -> vector<4x290xf32>
    %102 = vector.extract_strided_slice %101 {offsets = [0, 0], sizes = [4, 256], strides = [1, 1]} : vector<4x290xf32> to vector<4x256xf32>
    %103 = vector.broadcast %0 : vector<1x256xf32> to vector<4x256xf32>
    %104 = arith.mulf %102, %103 : vector<4x256xf32>
    %105 = vector.extract_strided_slice %101 {offsets = [0, 1], sizes = [4, 256], strides = [1, 1]} : vector<4x290xf32> to vector<4x256xf32>
    %106 = vector.extract_strided_slice %101 {offsets = [0, 2], sizes = [4, 256], strides = [1, 1]} : vector<4x290xf32> to vector<4x256xf32>
    %107 = vector.broadcast %1 : vector<1x256xf32> to vector<4x256xf32>
    %108 = arith.mulf %106, %107 : vector<4x256xf32>
    %109 = vector.extract_strided_slice %101 {offsets = [0, 16], sizes = [4, 256], strides = [1, 1]} : vector<4x290xf32> to vector<4x256xf32>
    %110 = vector.broadcast %0 : vector<1x256xf32> to vector<4x256xf32>
    %111 = arith.mulf %109, %110 : vector<4x256xf32>
    %112 = vector.extract_strided_slice %101 {offsets = [0, 17], sizes = [4, 256], strides = [1, 1]} : vector<4x290xf32> to vector<4x256xf32>
    %113 = vector.extract_strided_slice %101 {offsets = [0, 18], sizes = [4, 256], strides = [1, 1]} : vector<4x290xf32> to vector<4x256xf32>
    %114 = vector.broadcast %1 : vector<1x256xf32> to vector<4x256xf32>
    %115 = arith.mulf %113, %114 : vector<4x256xf32>
    %116 = vector.extract_strided_slice %101 {offsets = [0, 32], sizes = [4, 256], strides = [1, 1]} : vector<4x290xf32> to vector<4x256xf32>
    %117 = vector.broadcast %0 : vector<1x256xf32> to vector<4x256xf32>
    %118 = arith.mulf %116, %117 : vector<4x256xf32>
    %119 = vector.extract_strided_slice %101 {offsets = [0, 33], sizes = [4, 256], strides = [1, 1]} : vector<4x290xf32> to vector<4x256xf32>
    %120 = vector.extract_strided_slice %101 {offsets = [0, 34], sizes = [4, 256], strides = [1, 1]} : vector<4x290xf32> to vector<4x256xf32>
    %121 = vector.broadcast %1 : vector<1x256xf32> to vector<4x256xf32>
    %122 = arith.mulf %120, %121 : vector<4x256xf32>
    %123 = tpu.concatenate %104, %105, %108, %111, %112, %115, %118, %119, %122 in 0 : vector<4x256xf32>, vector<4x256xf32>, vector<4x256xf32>, vector<4x256xf32>, vector<4x256xf32>, vector<4x256xf32>, vector<4x256xf32>, vector<4x256xf32>, vector<4x256xf32> -> vector<36x256xf32>
    %124 = arith.truncf %123 : vector<36x256xf32> to vector<36x256xbf16>
    %cst_25 = arith.constant dense<0.000000e+00> : vector<4x256xf32>
    %125 = tpu.matmul %3, %124, %cst_25 {dimension_numbers = #tpu.dot_dimension_numbers<[1], [0], [0], [1], [0, 0, 1, 1], [], []>} : vector<4x36xbf16>, vector<36x256xbf16>, vector<4x256xf32> -> vector<4x256xf32>
    %126 = vector.broadcast %5 : vector<4x1xf32> to vector<4x256xf32>
    %127 = arith.addf %125, %126 : vector<4x256xf32>
    %128 = vector.extract_strided_slice %72 {offsets = [0, 17], sizes = [4, 256], strides = [1, 1]} : vector<4x290xf32> to vector<4x256xf32>
    %129 = arith.addf %127, %128 : vector<4x256xf32>
    %cst_26 = arith.constant 0.000000e+00 : f32
    %130 = vector.broadcast %cst_26 : f32 to vector<4x256xf32>
    %131 = arith.maximumf %129, %130 : vector<4x256xf32>
    %c1_27 = arith.constant 1 : index
    %c0_28 = arith.constant 0 : index
    %c0_29 = arith.constant 0 : index
    %132 = vector.load %arg8[%c1_27, %c0_28, %c0_29] : memref<2x4x256xf32, #tpu.memory_space<vmem>>, vector<1x4x256xf32>
    %133 = vector.shape_cast %132 : vector<1x4x256xf32> to vector<4x256xf32>
    %134 = vector.shape_cast %131 : vector<4x256xf32> to vector<1x4x256xf32>
    tpu.vector_store %arg8[%c1_27, %c0_28, %c0_29], %134 {strides = array<i32>} : memref<2x4x256xf32, #tpu.memory_space<vmem>>, vector<1x4x256xf32>,
    return
  }
  func.func @transform_0(%arg0: i32) -> (i32, i32, i32) {
    %c0_i32 = arith.constant 0 : i32
    %c0_i32_0 = arith.constant 0 : i32
    %c0_i32_1 = arith.constant 0 : i32
    return %arg0, %c0_i32, %c0_i32_0 : i32, i32, i32
  }
  func.func @transform_1(%arg0: i32) -> (i32, i32) {
    %c0_i32 = arith.constant 0 : i32
    %c0_i32_0 = arith.constant 0 : i32
    %c0_i32_1 = arith.constant 0 : i32
    return %c0_i32, %c0_i32_0 : i32, i32
  }
  func.func @transform_2(%arg0: i32) -> (i32, i32) {
    %c0_i32 = arith.constant 0 : i32
    %c0_i32_0 = arith.constant 0 : i32
    %c0_i32_1 = arith.constant 0 : i32
    return %c0_i32, %c0_i32_0 : i32, i32
  }
  func.func @transform_3(%arg0: i32) -> (i32, i32) {
    %c0_i32 = arith.constant 0 : i32
    %c0_i32_0 = arith.constant 0 : i32
    %c0_i32_1 = arith.constant 0 : i32
    return %c0_i32, %c0_i32_0 : i32, i32
  }
  func.func @transform_4(%arg0: i32) -> (i32, i32) {
    %c0_i32 = arith.constant 0 : i32
    %c0_i32_0 = arith.constant 0 : i32
    %c0_i32_1 = arith.constant 0 : i32
    return %c0_i32, %c0_i32_0 : i32, i32
  }
  func.func @transform_5(%arg0: i32) -> (i32, i32) {
    %c0_i32 = arith.constant 0 : i32
    %c0_i32_0 = arith.constant 0 : i32
    %c0_i32_1 = arith.constant 0 : i32
    return %c0_i32, %c0_i32_0 : i32, i32
  }
  func.func @transform_6(%arg0: i32) -> (i32, i32) {
    %c0_i32 = arith.constant 0 : i32
    %c0_i32_0 = arith.constant 0 : i32
    %c0_i32_1 = arith.constant 0 : i32
    return %c0_i32, %c0_i32_0 : i32, i32
  }
  func.func @transform_7(%arg0: i32) -> (i32, i32, i32) {
    %c0_i32 = arith.constant 0 : i32
    %c0_i32_0 = arith.constant 0 : i32
    %c0_i32_1 = arith.constant 0 : i32
    return %arg0, %c0_i32, %c0_i32_0 : i32, i32, i32
  }
}

</mosaic_0001>

<bundles_post_ra>
// kernel: tpu_custom_call.1
= control target key start
LH: loop header
LB: loop body
LE: loop exit
PB: predicated region body
PF: predicated region fallthrough
CT: control target
= control target key end

     0   :  { %12 = vsyncpa [#allocation3], 0  ;;  %s2426_s0 = inlined_call_operand.hbm [shape: f32[4,4,290], index: 0, kind: input, shape index: {}]   ;;  %s2427_s1 = inlined_call_operand.vmem [shape: f32[1,256], index: 1, kind: input, shape index: {}]   ;;  %s2428_s2 = inlined_call_operand.vmem [shape: f32[1,256], index: 2, kind: input, shape index: {}]   ;;  %s2429_s3 = inlined_call_operand.vmem [shape: bf16[4,36], index: 3, kind: input, shape index: {}]   ;;  %s2430_s4 = inlined_call_operand.vmem [shape: bf16[4,36], index: 4, kind: input, shape index: {}]   ;;  %s2431_s5 = inlined_call_operand.vmem [shape: f32[4,1], index: 5, kind: input, shape index: {}]   ;;  %s2432_s6 = inlined_call_operand.vmem [shape: f32[4,1], index: 6, kind: input, shape index: {}]   ;;  %s2433_s7 = inlined_call_operand.hbm [shape: f32[4,4,256], index: 7, kind: output, shape index: {}]  }
   0x1   :  { %14 = vsyncpa [#allocation3 + $0x1], 0 }
   0x2   :  { %15 = vsyncpa [#allocation4], 0 }
   0x3   :  { %17 = vsyncpa [#allocation4 + $0x1], 0  ;;  %s1772_s24 = smov 0   ;;  %s1774_s25 = smov 0  }
   0x4   :  { %s1776_s26 = smov 0   ;;  %s1778_s27 = smov 0  }
   0x5 LB: > { %s1793_s28 = sadd.s32 4294967295, %s1709_s27   ;;  %s1295_s29 = sadd.s32 4294967294, %s1709_s27   ;;  %s1709_s27 = sphi %s1778_s27, %s2454_s27   ;;  %s1705_s26 = sphi %s1776_s26, %s2453_s26   ;;  %s1701_s25 = sphi %s1774_s25, %s2452_s25   ;;  %s1697_s24 = sphi %s1772_s24, %s2451_s24  }
   0x6   : > { %s1797_s30 = sadd.s32 1, %s1709_s27   ;;  %s30_s8 = sadd.s32 1, %s1705_s26 }
   0x7   : > { %s27_s9 = ssub.s32 %s1709_s27, %s1797_s30  ;;  %p37_p0 = scmp.ne.s32.totalorder %s1705_s26, %s1701_s25 }
   0x8   : > { %p28_p1 = scmp.eq.s32.totalorder %s27_s9, 0  ;;  %p38_p2 = scmp.eq.s32.totalorder %s1709_s27, 0 }
   0x9   : > { %p43_p3 = scmp.ne.s32.totalorder %s1701_s25, %s1697_s24  ;;  %p44_p4 = scmp.eq.s32.totalorder %s1793_s28, 0 }
   0xa   : > { %s1809_s10 = scalar_select %p28_p1, %s1705_s26, %s30_s8  }
   0xb   : > { %p39_p5 = por %p38_p2, %p37_p0  ;;  %p1811_p6 = por %p44_p4, %p43_p3 }
   0xc   : > { %p193_p7 = scmp.eq.s32.totalorder %s1793_s28, 1  ;;  %p199_p8 = scmp.eq.s32.totalorder %s1295_s29, 1 }
   0xd   : > { %p1337_p10 = scmp.lt.s32.totalorder %s1709_s27, 2  ;;  %s237_s14 = sand.u32 1, %s1705_s26  }
   0xe   : > { %p1818_p11 = por %p193_p7, %p37_p0  ;;  %p1822_p12 = por %p199_p8, %p43_p3 }
   0xf   : > { %s1323_s15 = smul.u32 384, %s1709_s27  ;;  %p1833_p13 = pnand %p1337_p10, %p39_p5 }
  0x10   : > { %s2441_s12 = scalar_select %p1818_p11, 1, 0 }
  0x11   : > { %s2442_s13 = scalar_select %p1822_p12, 1, 0 }
  0x12   : > { %s1322_s16 = smul.u32 24, %s237_s14  ;;  %s1831_s19 = scalar_lea.hbm %s2426_s0, %s1323_s15 }
  0x13   : > { %s1839_s23 = scalar_lea.sflag [#allocation3], %s237_s14  ;;  %s1613_s29 = scalar_lea.hbm %s1831_s19, 384 }
  0x14   : > { %s241_s21 = scalar_lea.vmem [#allocation2], %s1322_s16  ;;  %p1614_p0 = scmp.ne.s32.totalorder %s1831_s19, %s1613_s29 }
  0x15   : > { %s249_s22 = sshll.u32 %s241_s21, 4  ;;  %p1615_p1 = pneg %p1833_p13  ;;  %s1837_s22 = int_to_ptr.vmem [resolvable:$true] %s249_s22 }
  0x16   : > { %s1618_s15 = scalar_lea.hbm %s2426_s0, 768  ;;  %p1619_p4 = scmp.lt.u32.totalorder %s1831_s19, %s2426_s0 }
  0x17   : > { %p1616_p2 = pnand %p1615_p1, %p1614_p0  ;;  %p1620_p5 = scmp.lt.u32.totalorder %s1618_s15, %s1613_s29 }
  0x18   : > { %p1622_p8 = scmp.lt.u32.totalorder %s1613_s29, %s1831_s19 }
  0x19   : > { %p1617_p3 = pneg %p1616_p2  ;;  %p1621_p7 = por %p1620_p5, %p1619_p4 }
  0x1b   : > { %p1623_p10 = por %p1622_p8, %p1621_p7 }
  0x1d   : > { %p1624_p9 = pnand %p1623_p10, %p1617_p3 }
  0x1f   : > { %1627 = shalt.err (!%p1624_p9)
}
  0x20   : > { %s1628_s14 = scalar_lea.vmem %s1837_s22, 384  ;;  %s1711_s16 = smov [#allocation2]  }
  0x21   : > { %p1629_p0 = scmp.ne.s32.totalorder %s1837_s22, %s1628_s14  ;;  %s1633_s21 = sshll.u32 %s1711_s16, 4  ;;  %s1634_s21 = int_to_ptr.vmem [resolvable:$false] %s1633_s21 }
  0x22   : > { %s1635_s8 = scalar_lea.vmem %s1634_s21, 768  ;;  %p1636_p11 = scmp.lt.s32.totalorder %s1837_s22, %s1634_s21 }
  0x23   : > { %p1631_p2 = pnand %p1629_p0, %p1615_p1  ;;  %p1637_p4 = scmp.lt.s32.totalorder %s1635_s8, %s1628_s14 }
  0x25   : > { %p1632_p12 = pneg %p1631_p2  ;;  %p1638_p5 = por %p1637_p4, %p1636_p11 }
  0x27   : > { %p1639_p7 = pnand %p1638_p5, %p1632_p12 }
  0x29   : > { %1642 = shalt.err (!%p1639_p7)
}
  0x2a   : > { %s1712_s29 = smov 192   ;;  %s1713_s9 = smov 12  }
  0x2b   : > { %1332 = dma.hbm_to_vmem [thread:$0]  (!%p1833_p13), %s1831_s19, 384, %s1837_s22, %s1839_s23, %s1712_s29, %s1712_s29, %s1713_s9  }
  0x2c   : > { %p1301_p9 = scmp.ge.s32.totalorder %s1709_s27, 1  ;;  %p257_p1 = scmp.lt.s32.totalorder %s1709_s27, 3 }
  0x2e   : > { %p258_p3 = pnand %p1301_p9, %p257_p1 }
  0x2f   : > { %s1870_s15 = sand.u32 (!%p258_p3), 1, %s1701_s25  }
  0x30   : > { %261 = sbr.rel (%p258_p3) target bundleno = 1085 (0x43d), region = 48  ;;  %s264_s18 = scalar_lea.sflag (!%p258_p3), [#allocation3], %s1870_s15 }
  0x31   : > { %s1324_s17 = smul.u32 (!%p258_p3), 24, %s1870_s15 }
  0x33   : > { %s1874_s14 = scalar_lea.vmem (!%p258_p3), [#allocation2], %s1324_s17 }
  0x37   : > { %1688 = dma.done.wait (%p1811_p6), %s264_s18, 384  }
  0x38   : > { %1690 = vsyncadd (%p1811_p6), %s264_s18, 4294966912  ;;  %v310_v0 = vlaneseq  ;;  %v302_v4 = vld [vmem:[%s2428_s2] sm:$0x3]  ;;  %s1714_s11 = smov 2   ;;  %s1715_s16 = smov 32   ;;  %v1918_v17 = vld [vmem:[%s1874_s14 + $0xc] sm:$0xff] }
  0x39   : > { %v301_v5 = vld [vmem:[%s2427_s1] sm:$0x3]  ;;  %s1716_s21 = smov 16   ;;  %s1717_s8 = smov 18   ;;  %v1928_v20 = vld [vmem:[%s1874_s14 + $0x14] sm:$0xf]  ;;  %v838_v21 = vcombine.low %v1918_v17, %v1918_v17 }
  0x3a   : > { %v311_v1 = vshrl.u32 %v310_v0, 7  ;;  %v1895_v10 = vld [vmem:[%s1874_s14 + $0x8] sm:$0xf]  ;;  %v1909_v14 = vld [vmem:[%s1874_s14] sm:$0xff]  ;;  %s1718_s29 = smov 34   ;;  %s1719_s9 = smov 127   ;;  %v839_v22 = vcombine.low %v1928_v20, %v1928_v20 }
  0x3b   : > { %v384_v13 = vcombine.low %v1895_v10, %v1895_v10  ;;  %v383_v15 = vcombine.low %v1909_v14, %v1909_v14  ;;  %v425_v19 = vcombine.high %v1909_v14, %v1909_v14  ;;  %s1720_s17 = smov 111   ;;  %s1721_s18 = smov 95   ;;  %vm336_vm0 = vcmask 15360  }
  0x3c   : > { %v312_v2 = vsub.s32 0, %v311_v1  ;;  %v316_v3 = vsub.s32 1, %v311_v1  ;;  %v1939_v23 = vpack.i.bf16 %v838_v21, %v839_v22  ;;  %vm363_vm1 = vcmask 261120   ;;  %s1722_s14 = smov 126   ;;  %s1723_s19 = smov 94  }
  0x3d   : > { %v1390_v16 = vpack.i.bf16 %v384_v13, %v1909_v14  ;;  %v1395_v18 = vpack.i.bf16 %v1918_v17, %v383_v15  ;;  %vm345_vm2 = vcmask 130048   ;;  %vm372_vm3 = vcmask 277504   ;;  %s2435_s20 = smov 112   ;;  %s2437_s22 = smov 96  }
  0x3e   : > { %v1886_v6 = vrot.slane %v302_v4, %v312_v2  ;;  %v1888_v7 = vrot.slane %v302_v4, %v316_v3  ;;  %v1890_v8 = vrot.slane %v301_v5, %v312_v2  ;;  %v1892_v9 = vrot.slane %v301_v5, %v316_v3  ;;  %s1726_s23 = smov 110   ;;  %p2448_p11 = scmp.ne.s32.totalorder %s2441_s12, 0 }
  0x3f   : > { %vm354_vm4 = vcmask 146432   ;;  %vm391_vm5 = vcmask 1039360   ;;  %vm405_vm6 = vcmask 1031168   ;;  %vm420_vm7 = vcmask 916480  }
  0x40   : > { %v332_v11 = vcombine.low %v1886_v6, %v1888_v7  ;;  %v1901_v12 = vcombine.low %v1890_v8, %v1892_v9  ;;  %vm491_vm8 = vcmask 1043456   ;;  %vm432_vm9 = vcmask 908288  }
  0x41   : > { %vm447_vm10 = vcmask 900096   ;;  %vm472_vm11 = vcmask 777216   ;;  %vm461_vm12 = vcmask 785408   ;;  %vm486_vm13 = vcmask 769024  }
  0x42   : > { %333 = vrot.lane.b32.xlu0 %v332_v11, %s1714_s11  ;;  %360 = vrot.lane.b32.xlu1 %v1901_v12, %s1715_s16  ;;  %vm515_vm14 = vcmask 1041408   ;;  %vm2439_vm15 = vcmask 293888  }
  0x46   : > { %342 = vrot.lane.b32.xlu0 %v1901_v12, %s1716_s21  ;;  %351 = vrot.lane.b32.xlu1 %v332_v11, %s1717_s8 }
  0x4a   : > { %369 = vrot.lane.b32.xlu0 %v332_v11, %s1718_s29  ;;  %1391 = vrot.lane.b32.xlu1 %v1390_v16, %s1719_s9 }
  0x4e   : > { %1396 = vrot.lane.b32.xlu0 %v1395_v18, %s1719_s9  ;;  %428 = vrot.lane.b32.xlu1 %v425_v19, %s1720_s17 }
  0x52   : > { %430 = vrot.lane.b32.xlu0 %v1895_v10, %s1720_s17  ;;  %1401 = vrot.lane.b32.xlu1 %v1390_v16, %s1721_s18 }
  0x56   : > { %426 = vrot.lane.b32.xlu0 %v1909_v14, %s1720_s17  ;;  %1406 = vrot.lane.b32.xlu1 %v1395_v18, %s1721_s18 }
  0x5a   : > { %1411 = vrot.lane.b32.xlu0 %v1939_v23, %s1719_s9 }
  0xb4   : > { %v334_v24 = vpop.permute.xlu0 %333  ;;  %v361_v25 = vpop.permute.xlu1 %360 }
  0xb5   : > { %v335_v26 = vrot.slane %v334_v24, 4  ;;  %v1944_v27 = vrot.slane %v361_v25, 4 }
  0xb7   : > { %v337_v28 = vsel %vm336_vm0, %v335_v26, %v334_v24  ;;  %v364_v29 = vsel %vm363_vm1, %v1944_v27, %v361_v25  ;;  %v341_v35 = vmul.f32 %v335_v26, %v1895_v10  ;;  %v824_v42 = vmul.f32 %v1928_v20, %v335_v26 }
  0xb8   : > { %v340_v30 = vmul.f32 %v337_v28, %v1909_v14  ;;  %v343_v31 = vpop.permute.xlu0 %342  ;;  %v367_v34 = vmul.f32 %v364_v29, %v1909_v14  ;;  %v352_v40 = vpop.permute.xlu1 %351  ;;  %v368_v46 = vmul.f32 %v1944_v27, %v1895_v10  ;;  %v823_v47 = vmul.f32 %v1918_v17, %v337_v28 }
  0xb9   : > { %v344_v32 = vrot.slane %v343_v31, 4  ;;  %v353_v49 = vrot.slane %v352_v40, 4  ;;  %v829_v56 = vmul.f32 %v1918_v17, %v364_v29  ;;  %v830_v22 = vmul.f32 %v1928_v20, %v1944_v27 }
  0xba   : > { %v398_v33 = vcombine.high %v340_v30, %v340_v30  ;;  %v454_v45 = vcombine.high %v367_v34, %v367_v34  ;;  %v1415_v54 = vpack.i.bf16 %v823_v47, %v824_v42  ;;  %v852_v0 = vcombine.high %v823_v47, %v823_v47 }
  0xbb   : > { %v346_v36 = vsel %vm345_vm2, %v344_v32, %v343_v31  ;;  %v350_v48 = vmul.f32 %v344_v32, %v1895_v10  ;;  %v359_v53 = vmul.f32 %v353_v49, %v1895_v10  ;;  %v355_v58 = vsel %vm354_vm4, %v353_v49, %v352_v40 }
  0xbc   : > { %v349_v37 = vmul.f32 %v346_v36, %v1909_v14  ;;  %v370_v38 = vpop.permute.xlu0 %369  ;;  %v1430_v39 = vpack.i.bf16 %v341_v35, %v398_v33  ;;  %v825_v44 = vmul.f32 %v1918_v17, %v346_v36  ;;  %v1445_v52 = vpack.i.bf16 %v368_v46, %v454_v45 }
  0xbd   : > { %v1954_v41 = vrot.slane %v370_v38, 4  ;;  %v413_v55 = vcombine.low %v350_v48, %v350_v48  ;;  %v440_v60 = vcombine.low %v359_v53, %v359_v53  ;;  %v904_v61 = vcombine.high %v829_v56, %v829_v56 }
  0xbe   : > { %v412_v43 = vcombine.low %v349_v37, %v349_v37  ;;  %1431 = vrot.lane.b32.xlu0 %v1430_v39, %s1722_s14  ;;  %v358_v63 = vmul.f32 %v355_v58, %v1909_v14  ;;  %v826_v2 = vmul.f32 %v1928_v20, %v344_v32  ;;  %v1435_v11 = vpack.i.bf16 %v852_v0, %v340_v30 }
  0xbf   : > { %v377_v50 = vmul.f32 %v1954_v41, %v1895_v10  ;;  %v373_v57 = vsel %vm372_vm3, %v1954_v41, %v370_v38  ;;  %v1420_v59 = vpack.i.bf16 %v413_v55, %v349_v37  ;;  %v1455_v4 = vpack.i.bf16 %v904_v61, %v367_v34  ;;  %v305_v34 = vld [vmem:[%s2431_s5] sm:$0xf] }
  0xc0   : > { %v1440_v51 = vpack.i.bf16 %v825_v44, %v412_v43  ;;  %v376_v62 = vmul.f32 %v373_v57, %v1909_v14  ;;  %v1425_v1 = vpack.i.bf16 %v440_v60, %v358_v63  ;;  %v439_v5 = vcombine.low %v358_v63, %v358_v63 }
  0xc1   : > { %484 = vrot.lane.b32.xlu1 %v377_v50, %s1723_s19  ;;  %v827_v10 = vmul.f32 %v1918_v17, %v355_v58  ;;  %v865_v13 = vcombine.low %v825_v44, %v825_v44  ;;  %v866_v16 = vcombine.low %v826_v2, %v826_v2  ;;  %v828_v18 = vmul.f32 %v1928_v20, %v353_v49 }
  0xc2   : > { %1441 = vrot.lane.b32.xlu0 %v1440_v51, %s2435_s20  ;;  %v479_v3 = vcombine.high %v376_v62, %v376_v62  ;;  %v877_v24 = vcombine.high %v1918_v17, %v1918_v17  ;;  %v1727_v28 = vmov 0   ;;  %v1470_v29 = vpack.i.bf16 %v829_v56, %v830_v22 }
  0xc3   : > { %v1450_v19 = vpack.i.bf16 %v827_v10, %v439_v5  ;;  %v1465_v21 = vpack.i.bf16 %v865_v13, %v866_v16  ;;  %v890_v25 = vcombine.low %v827_v10, %v827_v10  ;;  %v891_v26 = vcombine.low %v828_v18, %v828_v18  ;;  %554 = vmatprep.mubr.bf16.mxu0 %v1727_v28 }
  0xc4   : > { %v1460_v15 = vpack.i.bf16 %v479_v3, %v376_v62  ;;  %1490 = vset.pattern.permute.xlu1 %v1727_v28  ;;  %801 = vmatprep.mubr.bf16.mxu1 %v1727_v28  ;;  %v831_v27 = vmul.f32 %v1918_v17, %v373_v57  ;;  %v832_v32 = vmul.f32 %v1928_v20, %v1954_v41 }
  0xc5   : > { %1416 = vrot.lane.b32.xlu1 %v1415_v54, %s1722_s14  ;;  %1606 = vset.pattern.permute.xlu0 %v1727_v28  ;;  %v1475_v30 = vpack.i.bf16 %v890_v25, %v891_v26  ;;  %v322_v45 = vmul.f32 %v1901_v12, %v1909_v14  ;;  %v2055_v13 = vmul.f32 %v1918_v17, %v1901_v12 }
  0xc6   : > { %1446 = vrot.lane.b32.xlu0 %v1445_v52, %s2437_s22  ;;  %v927_v31 = vcombine.high %v831_v27, %v831_v27 }
  0xc7   : > { %v379_v52 = vcombine.high %v322_v45, %v322_v45 }
  0xc8   : > { %v1485_v33 = vpack.i.bf16 %v927_v31, %v831_v27 }
  0xc9   : > { %1421 = vrot.lane.b32.xlu1 %v1420_v59, %s2435_s20 }
  0xca   : > { %882 = vrot.lane.b32.xlu0 %v1928_v20, %s1720_s17  ;;  %v2023_v20 = vpop.permute.xlu0 %1396 }
  0xcb   : > { %v1398_v57 = vunpack.i.l.bf16 %v2023_v20  ;;  %v1399_v10 = vunpack.i.h.bf16 %v2023_v20 }
  0xcd   : > { %1426 = vrot.lane.b32.xlu1 %v1425_v1, %s1726_s23 }
  0xce   : > { %1456 = vrot.lane.b32.xlu0 %v1455_v4, %s2437_s22  ;;  %v431_v35 = vpop.permute.xlu0 %430 }
  0xd1   : > { %1436 = vrot.lane.b32.xlu1 %v1435_v11, %s1722_s14 }
  0xd2   : > { %1461 = vrot.lane.b32.xlu0 %v1460_v15, %s1723_s19  ;;  %v427_v37 = vpop.permute.xlu0 %426 }
  0xd5   : > { %1451 = vrot.lane.b32.xlu1 %v1450_v19, %s1726_s23 }
  0xd6   : > { %1466 = vrot.lane.b32.xlu0 %v1465_v21, %s2435_s20  ;;  %v2027_v39 = vpop.permute.xlu0 %1411 }
  0xd9   : > { %880 = vrot.lane.b32.xlu1 %v877_v24, %s1720_s17 }
  0xda   : > { %1471 = vrot.lane.b32.xlu0 %v1470_v29, %s2437_s22 }
  0xdd   : > { %1476 = vrot.lane.b32.xlu1 %v1475_v30, %s1726_s23 }
  0xde   : > { %878 = vrot.lane.b32.xlu0 %v1918_v17, %s1720_s17 }
  0xe1   : > { %1481 = vrot.lane.b32.xlu1 %v1939_v23, %s1721_s18  ;;  %v1392_v23 = vpop.permute.xlu1 %1391 }
  0xe2   : > { %932 = vrot.lane.b32.xlu0 %v832_v32, %s1723_s19  ;;  %v1394_v46 = vunpack.i.h.bf16 %v1392_v23  ;;  %v1393_v47 = vunpack.i.l.bf16 %v1392_v23 }
  0xe4   : > { %v393_v56 = vsel %vm391_vm5, %v1393_v47, %v1394_v46  ;;  %v392_v11 = vsel %vm391_vm5, %v1398_v57, %v1393_v47 }
  0xe5   : > { %1486 = vrot.lane.b32.xlu1 %v1485_v33, %s1723_s19  ;;  %v429_v36 = vpop.permute.xlu1 %428  ;;  %v493_v62 = vsel %vm491_vm8, %v379_v52, %v393_v56  ;;  %v492_v27 = vsel %vm491_vm8, %v322_v45, %v392_v11 }
  0xe6   : > { %591 = vrot.lane.b32.xlu0 %v1890_v8, %s1716_s21  ;;  %v2058_v15 = vsel %vm432_vm9, %v429_v36, %v431_v35  ;;  %v2066_v12 = vsel %vm432_vm9, %v427_v37, %v429_v36 }
  0xe9   : > { %508 = vperm.xlu1 %1490, %v305_v34   ;;  %v2025_v38 = vpop.permute.xlu1 %1401  ;;  %v1413_v34 = vunpack.i.l.bf16 %v2027_v39 }
  0xea   : > { %580 = vrot.lane.b32.xlu0 %v1886_v6, %s1714_s11  ;;  %v1404_v59 = vunpack.i.h.bf16 %v2025_v38  ;;  %v1403_v60 = vunpack.i.l.bf16 %v2025_v38 }
  0xec   : > { %v474_v22 = vsel %vm472_vm11, %v1403_v60, %v1404_v59 }
  0xed   : > { %593 = vrot.lane.b32.xlu1 %v1892_v9, %s1716_s21  ;;  %v2029_v40 = vpop.permute.xlu1 %1406 }
  0xee   : > { %602 = vrot.lane.b32.xlu0 %v1886_v6, %s1717_s8  ;;  %v1408_v16 = vunpack.i.l.bf16 %v2029_v40 }
  0xf0   : > { %v473_v20 = vsel %vm472_vm11, %v1408_v16, %v1403_v60 }
  0xf1   : > { %582 = vrot.lane.b32.xlu1 %v1888_v7, %s1714_s11 }
  0xf5   : > { %604 = vrot.lane.b32.xlu1 %v1888_v7, %s1717_s8  ;;  %s1728_s8 = smov 17  }
 0x130   : > { %v1432_v41 = vpop.permute.xlu0 %1431 }
 0x131   : > { %v1434_v49 = vunpack.i.h.bf16 %v1432_v41  ;;  %v1433_v50 = vunpack.i.l.bf16 %v1432_v41 }
 0x133   : > { %v2031_v42 = vpop.permute.xlu1 %484  ;;  %v407_v14 = vsel %vm405_vm6, %v1433_v50, %v1434_v49 }
 0x134   : > { %v2033_v43 = vpop.permute.xlu0 %1441 }
 0x135   : > { %v1443_v18 = vunpack.i.l.bf16 %v2033_v43  ;;  %v1444_v23 = vunpack.i.h.bf16 %v2033_v43 }
 0x137   : > { %v2035_v44 = vpop.permute.xlu1 %1416 }
 0x138   : > { %v1447_v48 = vpop.permute.xlu0 %1446 }
 0x139   : > { %v1449_v4 = vunpack.i.h.bf16 %v1447_v48  ;;  %v1448_v5 = vunpack.i.l.bf16 %v1447_v48 }
 0x13b   : > { %v1422_v51 = vpop.permute.xlu1 %1421  ;;  %v463_v17 = vsel %vm461_vm12, %v1448_v5, %v1449_v4 }
 0x13c   : > { %v1424_v53 = vunpack.i.h.bf16 %v1422_v51  ;;  %v1423_v54 = vunpack.i.l.bf16 %v1422_v51  ;;  %v2039_v55 = vpop.permute.xlu0 %882  ;;  %v499_v46 = vsel %vm491_vm8, %v463_v17, %v474_v22  ;;  %v1414_v51 = vunpack.i.h.bf16 %v2027_v39 }
 0x13d   : > { %v847_v39 = vsel %vm391_vm5, %v1399_v10, %v1413_v34 }
 0x13e   : > { %v422_v58 = vsel %vm420_vm7, %v1423_v54, %v1424_v53  ;;  %v421_v29 = vsel %vm420_vm7, %v1443_v18, %v1423_v54  ;;  %v1418_v54 = vunpack.i.l.bf16 %v2035_v44  ;;  %v846_v4 = vsel %vm391_vm5, %v1414_v51, %v1399_v10  ;;  %v303_v10 = vld [vmem:[%s2429_s3] sm:$0x3] }
 0x13f   : > { %v1427_v61 = vpop.permute.xlu1 %1426  ;;  %v495_v63 = vsel %vm491_vm8, %v407_v14, %v422_v58 }
 0x140   : > { %v1429_v0 = vunpack.i.h.bf16 %v1427_v61  ;;  %v1428_v1 = vunpack.i.l.bf16 %v1427_v61  ;;  %v2049_v2 = vpop.permute.xlu0 %1456  ;;  %v501_v3 = vpack.c.bf16 %v495_v63, %v493_v62  ;;  %v834_v61 = vcombine.high %v2055_v13, %v2055_v13 }
 0x141   : > { %v1458_v24 = vunpack.i.l.bf16 %v2049_v2 }
 0x142   : > { %522 = vmatprep.subr.bf16.mxu0 %v501_v3  ;;  %v449_v19 = vsel %vm447_vm10, %v1428_v1, %v1429_v0 }
 0x143   : > { %v1437_v21 = vpop.permute.xlu1 %1436  ;;  %v497_v33 = vsel %vm491_vm8, %v2058_v15, %v449_v19  ;;  %v462_v37 = vsel %vm461_vm12, %v1458_v24, %v1448_v5  ;;  %v939_v19 = vsel %vm491_vm8, %v834_v61, %v847_v39 }
 0x144   : > { %v1438_v25 = vunpack.i.l.bf16 %v1437_v21  ;;  %v1462_v26 = vpop.permute.xlu0 %1461  ;;  %v1439_v47 = vunpack.i.h.bf16 %v1437_v21  ;;  %v498_v58 = vsel %vm491_vm8, %v462_v37, %v473_v20 }
 0x145   : > { %v1464_v30 = vunpack.i.h.bf16 %v1462_v26  ;;  %v1463_v31 = vunpack.i.l.bf16 %v1462_v26 }
 0x146   : > { %v406_v32 = vsel %vm405_vm6, %v1438_v25, %v1433_v50  ;;  %v503_v50 = vpack.c.bf16 %v499_v46, %v497_v33  ;;  %v860_v62 = vsel %vm405_vm6, %v1439_v47, %v1418_v54 }
 0x147   : > { %v1452_v35 = vpop.permute.xlu1 %1451  ;;  %v494_v36 = vsel %vm491_vm8, %v406_v32, %v421_v29  ;;  %v488_v52 = vsel %vm486_vm13, %v1464_v30, %v2031_v42  ;;  %v487_v53 = vsel %vm486_vm13, %v1463_v31, %v1464_v30  ;;  %v1419_v42 = vunpack.i.h.bf16 %v2035_v44 }
 0x148   : > { %v1453_v38 = vunpack.i.l.bf16 %v1452_v35  ;;  %v1467_v41 = vpop.permute.xlu0 %1466  ;;  %v500_v45 = vpack.c.bf16 %v494_v36, %v492_v27  ;;  %v505_v63 = vpack.c.bf16 %v488_v52, %v488_v52  ;;  %v1454_v26 = vunpack.i.h.bf16 %v1452_v35 }
 0x149   : > { %v1469_v48 = vunpack.i.h.bf16 %v1467_v41  ;;  %v1468_v49 = vunpack.i.l.bf16 %v1467_v41  ;;  %v859_v5 = vsel %vm405_vm6, %v1419_v42, %v1439_v47  ;;  %v938_v29 = vsel %vm491_vm8, %v2055_v13, %v846_v4 }
 0x14a   : > { %v448_v43 = vsel %vm447_vm10, %v1453_v38, %v1428_v1  ;;  %523 = vmatpush1.bf16.msra.mxu0 %v500_v45  ;;  %v504_v1 = vpack.c.bf16 %v487_v53, %v487_v53  ;;  %v1409_v27 = vunpack.i.h.bf16 %v2029_v40  ;;  %v1459_v30 = vunpack.i.h.bf16 %v2049_v2 }
 0x14b   : > { %v874_v56 = vsel %vm420_vm7, %v1444_v23, %v1468_v49  ;;  %v881_v57 = vpop.permute.xlu1 %880  ;;  %524 = vmatprep.subr.bf16.mxu0 %v503_v50  ;;  %v496_v14 = vsel %vm491_vm8, %v2066_v12, %v448_v43  ;;  %v873_v0 = vsel %vm420_vm7, %v1469_v48, %v1444_v23 }
 0x14c   : > { %v1472_v59 = vpop.permute.xlu0 %1471  ;;  %v502_v60 = vpack.c.bf16 %v498_v58, %v496_v14  ;;  %v941_v3 = vsel %vm491_vm8, %v860_v62, %v874_v56  ;;  %v940_v21 = vsel %vm491_vm8, %v859_v5, %v873_v0  ;;  %v517_v24 = vsel %vm515_vm14, %v504_v1, 0 }
 0x14d   : > { %v1474_v22 = vunpack.i.h.bf16 %v1472_v59  ;;  %v947_v25 = vpack.c.bf16 %v941_v3, %v939_v19  ;;  %v1473_v17 = vunpack.i.l.bf16 %v1472_v59  ;;  %v946_v33 = vpack.c.bf16 %v940_v21, %v938_v29 }
 0x14e   : > { %525 = vmatpush1.bf16.msra.mxu0 %v502_v60  ;;  %v2117_v36 = vsel %vm432_vm9, %v881_v57, %v2039_v55 }
 0x14f   : > { %v1477_v44 = vpop.permute.xlu1 %1476  ;;  %1303 = vmatprep.subr.msk.bf16.mxu0 %vm515_vm14, %v505_v63  ;;  %v911_v40 = vsel %vm461_vm12, %v1474_v22, %v1459_v30  ;;  %v912_v2 = vsel %vm461_vm12, %v1459_v30, %v1473_v17 }
 0x150   : > { %v1479_v11 = vunpack.i.h.bf16 %v1477_v44  ;;  %v1478_v16 = vunpack.i.l.bf16 %v1477_v44  ;;  %v879_v18 = vpop.permute.xlu0 %878 }
 0x151   : > { %v2111_v31 = vsel %vm432_vm9, %v879_v18, %v881_v57 }
 0x152   : > { %527 = vmatpush1.bf16.msra.mxu0 %v517_v24  ;;  %v899_v34 = vsel %vm447_vm10, %v1454_v26, %v1478_v16  ;;  %v898_v20 = vsel %vm447_vm10, %v1479_v11, %v1454_v26 }
 0x153   : > { %v1482_v32 = vpop.permute.xlu1 %1481  ;;  %958 = vmatprep.subr.bf16.mxu0 %v947_v25  ;;  %v942_v38 = vsel %vm491_vm8, %v2111_v31, %v898_v20  ;;  %v943_v55 = vsel %vm491_vm8, %v2117_v36, %v899_v34 }
 0x154   : > { %v1484_v23 = vunpack.i.h.bf16 %v1482_v32  ;;  %v1483_v35 = vunpack.i.l.bf16 %v1482_v32  ;;  %v933_v51 = vpop.permute.xlu0 %932 }
 0x155   : > { %1304 = vmatmul.mubr.msk.bf16.vlgmr.msra.gmra.mrb[0].mxu0 %vm2439_vm15, %v303_v10 }
 0x156   : > { %v921_v13 = vsel %vm472_vm11, %v1484_v23, %v1409_v27  ;;  %v922_v37 = vsel %vm472_vm11, %v1409_v27, %v1483_v35  ;;  %959 = vmatpush1.bf16.msra.mxu0 %v946_v33  ;;  %990 = vmatprep.mubr.bf16.mxu0 %v1727_v28 }
 0x157   : > { %v1487_v41 = vpop.permute.xlu1 %1486  ;;  %v945_v45 = vsel %vm491_vm8, %v912_v2, %v922_v37  ;;  %v944_v46 = vsel %vm491_vm8, %v911_v40, %v921_v13 }
 0x158   : > { %v1489_v47 = vunpack.i.h.bf16 %v1487_v41  ;;  %v1488_v48 = vunpack.i.l.bf16 %v1487_v41  ;;  %v949_v49 = vpack.c.bf16 %v945_v45, %v943_v55  ;;  %v948_v50 = vpack.c.bf16 %v944_v46, %v942_v38  ;;  %v2144_v16 = vpop.permute.xlu0 %591 }
 0x15a   : > { %v935_v52 = vsel %vm486_vm13, %v1489_v47, %v933_v51  ;;  %960 = vmatprep.subr.bf16.mxu0 %v949_v49  ;;  %v934_v43 = vsel %vm486_vm13, %v1488_v48, %v1489_v47 }
 0x15b   : > { %v951_v53 = vpack.c.bf16 %v935_v52, %v935_v52  ;;  %961 = vmatpush1.bf16.msra.mxu0 %v948_v50  ;;  %v950_v54 = vpack.c.bf16 %v934_v43, %v934_v43 }
 0x15c   : > { %v2148_v19 = vpop.permute.xlu0 %580 }
 0x15d   : > { %1309 = vmatprep.subr.msk.bf16.mxu0 %vm515_vm14, %v951_v53  ;;  %v953_v56 = vsel %vm515_vm14, %v950_v54, 0 }
 0x15f   : > { %963 = vmatpush1.bf16.msra.mxu0 %v953_v56 }
 0x162   : > { %1310 = vmatmul.mubr.msk.bf16.vlgmr.msra.gmra.mrb[4].mxu0 %vm2439_vm15, %v303_v10  ;;  %vm571_vm15 = vcmask 138240  }
 0x168   : > { %v509_v57 = vpop.permute.xlu1 %508 }
 0x16c   : > { %v2146_v18 = vpop.permute.xlu1 %593 }
 0x16d   : > { %v595_v45 = vsel %vm345_vm2, %v2144_v16, %v2146_v18 }
 0x170   : > { %v2150_v21 = vpop.permute.xlu1 %582 }
 0x171   : > { %v584_v25 = vsel %vm336_vm0, %v2148_v19, %v2150_v21  ;;  %vm2446_vm0 = vcmask 293888  }
 0x174   : > { %v2154_v22 = vpop.permute.xlu1 %604 }
 0x228   : > { %v556_v14 = vpop.f32.mrb[0].mxu0 }
 0x229   : > { %v557_v58 = vadd.f32 %v556_v14, %v509_v57  ;;  %v558_v39 = vpop.f32.mrb[1].mxu0 }
 0x22a   : > { %v559_v42 = vadd.f32 %v558_v39, %v509_v57  ;;  %v560_v59 = vpop.f32.mrb[2].mxu0 }
 0x22b   : > { %v563_v60 = vmax.f32 %v557_v58, 0.0  ;;  %v561_v61 = vpop.f32.mrb[3].mxu0 }
 0x22c   : > { %v564_v62 = vmax.f32 %v559_v42, 0.0 }
 0x22d   : > { %567 = vrot.lane.b32.xlu0 %v563_v60, %s1728_s8 }
 0x22e   : > { %569 = vrot.lane.b32.xlu1 %v564_v62, %s1728_s8 }
 0x231   : > { %613 = vrot.lane.b32.xlu0 %v1890_v8, %s1715_s16 }
 0x232   : > { %615 = vrot.lane.b32.xlu1 %v1892_v9, %s1715_s16  ;;  %s2444_s16 = smov 96  }
 0x235   : > { %v992_v63 = vpop.f32.mrb[4].mxu0  ;;  %624 = vrot.lane.b32.xlu0 %v1886_v6, %s1718_s29  ;;  %v2152_v6 = vpop.permute.xlu0 %602 }
 0x236   : > { %v993_v0 = vadd.f32 %v992_v63, %v509_v57  ;;  %v994_v1 = vpop.f32.mrb[5].mxu0  ;;  %626 = vrot.lane.b32.xlu1 %v1888_v7, %s1718_s29  ;;  %v606_v13 = vsel %vm354_vm4, %v2152_v6, %v2154_v22  ;;  %s2445_s29 = smov 112  }
 0x237   : > { %v995_v3 = vadd.f32 %v994_v1, %v509_v57  ;;  %v996_v4 = vpop.f32.mrb[6].mxu0 }
 0x238   : > { %v999_v5 = vmax.f32 %v993_v0, 0.0  ;;  %v997_v44 = vpop.f32.mrb[7].mxu0 }
 0x239   : > { %v1000_v11 = vmax.f32 %v995_v3, 0.0 }
 0x23a   : > { %1003 = vrot.lane.b32.xlu0 %v999_v5, %s1728_s8 }
 0x23b   : > { %1005 = vrot.lane.b32.xlu1 %v1000_v11, %s1728_s8 }
 0x29f   : > { %v568_v7 = vpop.permute.xlu0 %567 }
 0x2a0   : > { %v570_v24 = vpop.permute.xlu1 %569  ;;  %v2202_v51 = vsel %vm571_vm15, 0.0, %v568_v7 }
 0x2a1   : > { %v2160_v26 = vsel %vm571_vm15, %v568_v7, %v570_v24  ;;  %v577_v17 = vsel %vm571_vm15, %v570_v24, 0.0  ;;  %v637_v62 = vrot.slane %v2202_v51, 4  ;;  %v599_v1 = vmul.f32 %v2144_v16, %v2202_v51 }
 0x2a2   : > { %v1491_v10 = vpack.i.bf16 %v577_v17, %v2160_v26  ;;  %v589_v29 = vmul.f32 %v584_v25, %v2160_v26  ;;  %v590_v27 = vmul.f32 %v2150_v21, %v577_v17  ;;  %v638_v30 = vrot.slane %v2160_v26, 4 }
 0x2a3   : > { %v2167_v32 = vpop.permute.xlu0 %613  ;;  %v639_v33 = vrot.slane %v577_v17, 4  ;;  %v611_v41 = vmul.f32 %v606_v13, %v2160_v26  ;;  %v612_v55 = vmul.f32 %v2154_v22, %v577_v17  ;;  %v600_v49 = vmul.f32 %v595_v45, %v2160_v26 }
 0x2a4   : > { %v2169_v34 = vpop.permute.xlu1 %615  ;;  %1492 = vrot.lane.b32.xlu0 %v1491_v10, %s1720_s17  ;;  %v1501_v20 = vpack.i.bf16 %v590_v27, %v589_v29  ;;  %v601_v50 = vmul.f32 %v2146_v18, %v577_v17  ;;  %v588_v5 = vmul.f32 %v2148_v19, %v2202_v51  ;;  %v666_v7 = vrot.slane %v599_v1, 4 }
 0x2a5   : > { %v617_v23 = vsel %vm363_vm1, %v2167_v32, %v2169_v34  ;;  %v623_v40 = vmul.f32 %v2169_v34, %v577_v17  ;;  %v1496_v2 = vpack.i.bf16 %v639_v33, %v638_v30  ;;  %v693_v54 = vrot.slane %v611_v41, 4  ;;  %vm2447_vm1 = vmmov %vm2446_vm0 }
 0x2a6   : > { %v622_v35 = vmul.f32 %v617_v23, %v2160_v26  ;;  %1502 = vrot.lane.b32.xlu1 %v1501_v20, %s1722_s14  ;;  %v694_v56 = vrot.slane %v612_v55, 4  ;;  %v667_v39 = vrot.slane %v600_v49, 4  ;;  %v668_v42 = vrot.slane %v601_v50, 4 }
 0x2a7   : > { %v2181_v37 = vpop.permute.xlu0 %624  ;;  %v610_v24 = vmul.f32 %v2152_v6, %v2202_v51  ;;  %v621_v27 = vmul.f32 %v2167_v32, %v2202_v51 }
 0x2a8   : > { %v2183_v38 = vpop.permute.xlu1 %626  ;;  %1497 = vrot.lane.b32.xlu0 %v1496_v2, %s1719_s9  ;;  %v1506_v48 = vpack.i.bf16 %v623_v40, %v622_v35  ;;  %v632_v52 = vmul.f32 %v2181_v37, %v2202_v51  ;;  %v1526_v59 = vpack.i.bf16 %v694_v56, %v693_v54  ;;  %v1521_v61 = vpack.i.bf16 %v668_v42, %v667_v39 }
 0x2a9   : > { %v2194_v46 = vsel %vm372_vm3, %v2181_v37, %v2183_v38  ;;  %v634_v43 = vmul.f32 %v2183_v38, %v577_v17 }
 0x2aa   : > { %v633_v47 = vmul.f32 %v2194_v46, %v2160_v26  ;;  %1512 = vrot.lane.b32.xlu1 %v1496_v2, %s1721_s18  ;;  %v692_v2 = vrot.slane %v610_v24, 4 }
 0x2ac   : > { %1507 = vrot.lane.b32.xlu0 %v1506_v48, %s2444_s16  ;;  %v1004_v53 = vpop.permute.xlu0 %1003  ;;  %v1516_v58 = vpack.i.bf16 %v633_v47, %v632_v52 }
 0x2ad   : > { %v1006_v57 = vpop.permute.xlu1 %1005  ;;  %v2231_v17 = vsel %vm571_vm15, 0.0, %v1004_v53 }
 0x2ae   : > { %v2209_v14 = vsel %vm571_vm15, %v1004_v53, %v1006_v57  ;;  %735 = vrot.lane.b32.xlu1 %v634_v43, %s1723_s19  ;;  %v1012_v10 = vsel %vm571_vm15, %v1006_v57, 0.0  ;;  %v1032_v20 = vrot.slane %v2231_v17, 4  ;;  %v1015_v55 = vmul.f32 %v2231_v17, %v2148_v19 }
 0x2af   : > { %v1033_v60 = vrot.slane %v2209_v14, 4  ;;  %v1019_v0 = vmul.f32 %v2209_v14, %v595_v45  ;;  %v1531_v3 = vpack.i.bf16 %v2209_v14, %v2202_v51  ;;  %v1016_v4 = vmul.f32 %v2209_v14, %v584_v25 }
 0x2b0   : > { %1517 = vrot.lane.b32.xlu0 %v1516_v58, %s1723_s19  ;;  %v1022_v11 = vmul.f32 %v2209_v14, %v606_v13  ;;  %v1025_v29 = vmul.f32 %v2209_v14, %v617_v23  ;;  %v1034_v35 = vrot.slane %v1012_v10, 4  ;;  %v1018_v13 = vmul.f32 %v2231_v17, %v2144_v16 }
 0x2b1   : > { %v1536_v63 = vpack.i.bf16 %v1033_v60, %v637_v62  ;;  %v1062_v44 = vrot.slane %v1019_v0, 4  ;;  %v1541_v25 = vpack.i.bf16 %v1016_v4, %v588_v5  ;;  %v1020_v41 = vmul.f32 %v1012_v10, %v2146_v18 }
 0x2b2   : > { %1527 = vrot.lane.b32.xlu1 %v1526_v59, %s1726_s23  ;;  %v1088_v33 = vrot.slane %v1022_v11, 4  ;;  %v1546_v40 = vpack.i.bf16 %v1025_v29, %v621_v27  ;;  %v1017_v45 = vmul.f32 %v1012_v10, %v2150_v21  ;;  %v1556_v47 = vpack.i.bf16 %v1032_v20, %v1034_v35 }
 0x2b3   : > { %v1561_v30 = vpack.i.bf16 %v1062_v44, %v666_v7  ;;  %v1061_v48 = vrot.slane %v1018_v13, 4  ;;  %v1063_v49 = vrot.slane %v1020_v41, 4  ;;  %v1021_v50 = vmul.f32 %v2231_v17, %v2152_v6 }
 0x2b4   : > { %1522 = vrot.lane.b32.xlu0 %v1521_v61, %s2445_s29  ;;  %v1566_v23 = vpack.i.bf16 %v1088_v33, %v692_v2  ;;  %v1023_v16 = vmul.f32 %v1012_v10, %v2154_v22  ;;  %v1571_v18 = vpack.i.bf16 %v1015_v55, %v1017_v45  ;;  %v1576_v21 = vpack.i.bf16 %v2231_v17, %v1012_v10 }
 0x2b5   : > { %v1586_v52 = vpack.i.bf16 %v1061_v48, %v1063_v49  ;;  %v1087_v43 = vrot.slane %v1021_v50, 4  ;;  %v1024_v53 = vmul.f32 %v2231_v17, %v2167_v32  ;;  %v1026_v54 = vmul.f32 %v1012_v10, %v2169_v34  ;;  %v306_v34 = vld [vmem:[%s2432_s6] sm:$0xf] }
 0x2b6   : > { %1537 = vrot.lane.b32.xlu1 %v1536_v63, %s1719_s9  ;;  %v1089_v19 = vrot.slane %v1023_v16, 4  ;;  %v1027_v56 = vmul.f32 %v2231_v17, %v2181_v37  ;;  %v1028_v57 = vmul.f32 %v2209_v14, %v2194_v46  ;;  %v1029_v32 = vmul.f32 %v1012_v10, %v2183_v38 }
 0x2b7   : > { %v1581_v22 = vpack.i.bf16 %v1024_v53, %v1026_v54  ;;  %v579_v7 = vmul.f32 %v2160_v26, %v1892_v9 }
 0x2b8   : > { %1532 = vrot.lane.b32.xlu0 %v1531_v3, %s1720_s17  ;;  %v1591_v6 = vpack.i.bf16 %v1087_v43, %v1089_v19  ;;  %v1601_v58 = vpack.i.bf16 %v1028_v57, %v1027_v56 }
 0x2ba   : > { %1552 = vrot.lane.b32.xlu1 %v1536_v63, %s1721_s18 }
 0x2bc   : > { %1542 = vrot.lane.b32.xlu0 %v1541_v25, %s1722_s14 }
 0x2be   : > { %1562 = vrot.lane.b32.xlu1 %v1561_v30, %s2445_s29 }
 0x2c0   : > { %1547 = vrot.lane.b32.xlu0 %v1546_v40, %s2444_s16 }
 0x2c2   : > { %1567 = vrot.lane.b32.xlu1 %v1566_v23, %s1726_s23 }
 0x2c4   : > { %1557 = vrot.lane.b32.xlu0 %v1556_v47, %s1719_s9 }
 0x2c6   : > { %1572 = vrot.lane.b32.xlu1 %v1571_v18, %s1722_s14  ;;  %v578_v18 = vmul.f32 %v2202_v51, %v1890_v8 }
 0x2c8   : > { %1587 = vrot.lane.b32.xlu0 %v1586_v52, %s2445_s29 }
 0x2ca   : > { %1577 = vrot.lane.b32.xlu1 %v1576_v21, %s1720_s17 }
 0x2cc   : > { %1592 = vrot.lane.b32.xlu0 %v1591_v6, %s1726_s23  ;;  %s1321_s23 = sshll.u32 %s1793_s28, 8  ;;  %s1729_s28 = smov [#allocation5]  }
 0x2cd   : > { %s2382_s8 = scalar_lea.hbm %s2433_s7, %s1321_s23  ;;  %s1647_s9 = sshll.u32 %s1729_s28, 4  ;;  %s1648_s9 = int_to_ptr.vmem [resolvable:$false] %s1647_s9 }
 0x2ce   : > { %1582 = vrot.lane.b32.xlu1 %v1581_v22, %s2444_s16  ;;  %s1208_s16 = scalar_lea.sflag [#allocation4], %s1870_s15  ;;  %s1649_s17 = scalar_lea.vmem %s1648_s9, 512 }
 0x2d0   : > { %1597 = vrot.lane.b32.xlu0 %v1556_v47, %s1721_s18 }
 0x2d2   : > { %1602 = vrot.lane.b32.xlu1 %v1601_v58, %s1723_s19 }
 0x2d4   : > { %1130 = vrot.lane.b32.xlu0 %v1029_v32, %s1723_s19  ;;  %s1302_s19 = sshll.u32 %s1870_s15, 4 }
 0x2d5   : > { %s297_s20 = scalar_lea.vmem [#allocation5], %s1302_s19 }
 0x2d6   : > { %757 = vperm.xlu1 %1490, %v306_v34   ;;  %s1222_s22 = sshll.u32 %s297_s20, 4  ;;  %s2377_s22 = int_to_ptr.vmem [resolvable:$true] %s1222_s22 }
 0x2d7   : > { %s1643_s29 = scalar_lea.vmem %s2377_s22, 256  ;;  %p1650_p8 = scmp.lt.s32.totalorder %s2377_s22, %s1648_s9 }
 0x2d8   : > { %p1644_p6 = scmp.ne.s32.totalorder %s2377_s22, %s1643_s29  ;;  %p1651_p10 = scmp.lt.s32.totalorder %s1649_s17, %s1643_s29 }
 0x2da   : > { %p1645_p12 = pnand %p1644_p6, %p2448_p11  ;;  %p1652_p0 = por %p1651_p10, %p1650_p8 }
 0x2dc   : > { %p1646_p13 = pneg %p1645_p12 }
 0x2de   : > { %p1653_p2 = pnand %p1652_p0, %p1646_p13 }
 0x316   : > { %v2273_v37 = vpop.permute.xlu0 %1492 }
 0x317   : > { %v1495_v40 = vunpack.i.h.bf16 %v2273_v37  ;;  %v1494_v2 = vunpack.i.l.bf16 %v2273_v37 }
 0x318   : > { %v1503_v39 = vpop.permute.xlu1 %1502 }
 0x319   : > { %v1505_v38 = vunpack.i.h.bf16 %v1503_v39  ;;  %v1504_v1 = vunpack.i.l.bf16 %v1503_v39  ;;  %v686_v50 = vsel %vm432_vm9, %v1494_v2, %v1495_v40 }
 0x31a   : > { %v1498_v46 = vpop.permute.xlu0 %1497 }
 0x31b   : > { %v1500_v62 = vunpack.i.h.bf16 %v1498_v46  ;;  %v1499_v63 = vunpack.i.l.bf16 %v1498_v46  ;;  %v660_v24 = vsel %vm405_vm6, %v1504_v1, %v1505_v38 }
 0x31c   : > { %v2275_v42 = vpop.permute.xlu1 %1512 }
 0x31d   : > { %v647_v44 = vsel %vm391_vm5, %v1499_v63, %v1500_v62  ;;  %v1515_v47 = vunpack.i.h.bf16 %v2275_v42  ;;  %v1514_v48 = vunpack.i.l.bf16 %v2275_v42 }
 0x31e   : > { %v1508_v59 = vpop.permute.xlu0 %1507  ;;  %v742_v29 = vsel %vm491_vm8, %v579_v7, %v647_v44 }
 0x31f   : > { %v1510_v13 = vunpack.i.h.bf16 %v1508_v59  ;;  %v1509_v41 = vunpack.i.l.bf16 %v1508_v59  ;;  %v725_v51 = vsel %vm472_vm11, %v1514_v48, %v1515_v47  ;;  %v1013_v47 = vmul.f32 %v2231_v17, %v1890_v8 }
 0x320   : > { %v736_v60 = vpop.permute.xlu1 %735 }
 0x321   : > { %v715_v43 = vsel %vm461_vm12, %v1509_v41, %v1510_v13 }
 0x322   : > { %v1518_v61 = vpop.permute.xlu0 %1517  ;;  %v748_v42 = vsel %vm491_vm8, %v715_v43, %v725_v51 }
 0x323   : > { %v1520_v19 = vunpack.i.h.bf16 %v1518_v61  ;;  %v1519_v21 = vunpack.i.l.bf16 %v1518_v61 }
 0x324   : > { %v1528_v0 = vpop.permute.xlu1 %1527 }
 0x325   : > { %v1530_v30 = vunpack.i.h.bf16 %v1528_v0  ;;  %v1529_v33 = vunpack.i.l.bf16 %v1528_v0  ;;  %v738_v59 = vsel %vm486_vm13, %v1520_v19, %v736_v60  ;;  %v737_v0 = vsel %vm486_vm13, %v1519_v21, %v1520_v19 }
 0x326   : > { %v1523_v3 = vpop.permute.xlu0 %1522  ;;  %v754_v7 = vpack.c.bf16 %v738_v59, %v738_v59 }
 0x327   : > { %v1525_v4 = vunpack.i.h.bf16 %v1523_v3  ;;  %v1524_v5 = vunpack.i.l.bf16 %v1523_v3  ;;  %v702_v55 = vsel %vm447_vm10, %v1529_v33, %v1530_v30 }
 0x328   : > { %v2278_v11 = vpop.permute.xlu1 %1537  ;;  %v746_v54 = vsel %vm491_vm8, %v686_v50, %v702_v55 }
 0x329   : > { %v676_v10 = vsel %vm420_vm7, %v1524_v5, %v1525_v4  ;;  %v1539_v26 = vunpack.i.l.bf16 %v2278_v11 }
 0x32a   : > { %v2284_v25 = vpop.permute.xlu0 %1532  ;;  %v744_v27 = vsel %vm491_vm8, %v660_v24, %v676_v10  ;;  %v753_v10 = vpack.c.bf16 %v737_v0, %v737_v0 }
 0x32b   : > { %v750_v20 = vpack.c.bf16 %v744_v27, %v742_v29  ;;  %v646_v52 = vsel %vm391_vm5, %v1539_v26, %v1499_v63  ;;  %v1534_v6 = vunpack.i.l.bf16 %v2284_v25  ;;  %v752_v63 = vpack.c.bf16 %v748_v42, %v746_v54 }
 0x32c   : > { %v2288_v35 = vpop.permute.xlu1 %1552  ;;  %v741_v34 = vsel %vm491_vm8, %v578_v18, %v646_v52  ;;  %v1540_v29 = vunpack.i.h.bf16 %v2278_v11  ;;  %v1535_v19 = vunpack.i.h.bf16 %v2284_v25 }
 0x32d   : > { %769 = vmatprep.subr.bf16.mxu1 %v750_v20  ;;  %v1554_v58 = vunpack.i.l.bf16 %v2288_v35  ;;  %v685_v38 = vsel %vm432_vm9, %v1534_v6, %v1494_v2 }
 0x32e   : > { %v2293_v23 = vpop.permute.xlu0 %1542 }
 0x32f   : > { %v1544_v45 = vunpack.i.l.bf16 %v2293_v23  ;;  %v724_v3 = vsel %vm472_vm11, %v1554_v58, %v1514_v48 }
 0x330   : > { %v1563_v49 = vpop.permute.xlu1 %1562 }
 0x331   : > { %v1564_v16 = vunpack.i.l.bf16 %v1563_v49  ;;  %v659_v56 = vsel %vm405_vm6, %v1544_v45, %v1504_v1  ;;  %v1565_v2 = vunpack.i.h.bf16 %v1563_v49  ;;  %v1014_v45 = vmul.f32 %v2209_v14, %v1892_v9 }
 0x332   : > { %v2304_v53 = vpop.permute.xlu0 %1547 }
 0x333   : > { %v1549_v22 = vunpack.i.l.bf16 %v2304_v53  ;;  %v675_v57 = vsel %vm420_vm7, %v1564_v16, %v1524_v5 }
 0x334   : > { %v2313_v32 = vpop.permute.xlu1 %1567  ;;  %v743_v37 = vsel %vm491_vm8, %v659_v56, %v675_v57 }
 0x335   : > { %v1569_v39 = vunpack.i.l.bf16 %v2313_v32  ;;  %v749_v46 = vpack.c.bf16 %v743_v37, %v741_v34  ;;  %v714_v61 = vsel %vm461_vm12, %v1549_v22, %v1509_v41  ;;  %v304_v22 = vld [vmem:[%s2430_s4] sm:$0x3]  ;;  %v1570_v56 = vunpack.i.h.bf16 %v2313_v32 }
 0x336   : > { %v1558_v62 = vpop.permute.xlu0 %1557  ;;  %v747_v24 = vsel %vm491_vm8, %v714_v61, %v724_v3  ;;  %v1555_v34 = vunpack.i.h.bf16 %v2288_v35  ;;  %v1550_v37 = vunpack.i.h.bf16 %v2304_v53 }
 0x337   : > { %v701_v1 = vsel %vm447_vm10, %v1569_v39, %v1529_v33  ;;  %770 = vmatpush1.bf16.msra.mxu1 %v749_v46  ;;  %v1559_v4 = vunpack.i.l.bf16 %v1558_v62  ;;  %v1560_v27 = vunpack.i.h.bf16 %v1558_v62  ;;  %v1545_v33 = vunpack.i.h.bf16 %v2293_v23 }
 0x338   : > { %v1573_v5 = vpop.permute.xlu1 %1572  ;;  %771 = vmatprep.subr.bf16.mxu1 %v752_v63  ;;  %v745_v44 = vsel %vm491_vm8, %v685_v38, %v701_v1  ;;  %v764_v23 = vsel %vm515_vm14, %v753_v10, 0 }
 0x339   : > { %v1574_v60 = vunpack.i.l.bf16 %v1573_v5  ;;  %v1575_v30 = vunpack.i.h.bf16 %v1573_v5  ;;  %v751_v40 = vpack.c.bf16 %v747_v24, %v745_v44  ;;  %v1042_v41 = vsel %vm391_vm5, %v1540_v29, %v1559_v4 }
 0x33a   : > { %v1588_v20 = vpop.permute.xlu0 %1587  ;;  %v1041_v49 = vsel %vm391_vm5, %v1560_v27, %v1540_v29  ;;  %v1137_v17 = vsel %vm491_vm8, %v1014_v45, %v1042_v41 }
 0x33b   : > { %v1590_v26 = vunpack.i.h.bf16 %v1588_v20  ;;  %v1589_v13 = vunpack.i.l.bf16 %v1588_v20  ;;  %772 = vmatpush1.bf16.msra.mxu1 %v751_v40  ;;  %v1055_v11 = vsel %vm405_vm6, %v1545_v33, %v1574_v60  ;;  %v1054_v16 = vsel %vm405_vm6, %v1575_v30, %v1545_v33 }
 0x33c   : > { %v1578_v55 = vpop.permute.xlu1 %1577  ;;  %1305 = vmatprep.subr.msk.bf16.mxu1 %vm515_vm14, %v754_v7  ;;  %v1136_v58 = vsel %vm491_vm8, %v1013_v47, %v1041_v49 }
 0x33d   : > { %v1070_v48 = vsel %vm420_vm7, %v1590_v26, %v1565_v2  ;;  %v1071_v50 = vsel %vm420_vm7, %v1565_v2, %v1589_v13  ;;  %v1580_v18 = vunpack.i.h.bf16 %v1578_v55  ;;  %v1579_v21 = vunpack.i.l.bf16 %v1578_v55 }
 0x33e   : > { %v1593_v52 = vpop.permute.xlu0 %1592  ;;  %v1139_v9 = vsel %vm491_vm8, %v1055_v11, %v1071_v50  ;;  %v1138_v43 = vsel %vm491_vm8, %v1054_v16, %v1070_v48 }
 0x33f   : > { %v1595_v14 = vunpack.i.h.bf16 %v1593_v52  ;;  %v1594_v8 = vunpack.i.l.bf16 %v1593_v52  ;;  %774 = vmatpush1.bf16.msra.mxu1 %v764_v23  ;;  %v1145_v6 = vpack.c.bf16 %v1139_v9, %v1137_v17  ;;  %v1080_v25 = vsel %vm432_vm9, %v1580_v18, %v1535_v19 }
 0x340   : > { %v1583_v54 = vpop.permute.xlu1 %1582  ;;  %v1144_v46 = vpack.c.bf16 %v1138_v43, %v1136_v58  ;;  %v1081_v32 = vsel %vm432_vm9, %v1535_v19, %v1579_v21 }
 0x341   : > { %v1585_v57 = vunpack.i.h.bf16 %v1583_v54  ;;  %v1584_v51 = vunpack.i.l.bf16 %v1583_v54  ;;  %1156 = vmatprep.subr.bf16.mxu1 %v1145_v6  ;;  %v1096_v42 = vsel %vm447_vm10, %v1595_v14, %v1570_v56  ;;  %v1097_v59 = vsel %vm447_vm10, %v1570_v56, %v1594_v8 }
 0x342   : > { %v1598_v39 = vpop.permute.xlu0 %1597  ;;  %1306 = vmatmul.mubr.msk.bf16.vlgmr.msra.gmra.mrb[0].mxu1 %vm2446_vm0, %v304_v22  ;;  %v1141_v5 = vsel %vm491_vm8, %v1081_v32, %v1097_v59  ;;  %v1140_v7 = vsel %vm491_vm8, %v1080_v25, %v1096_v42 }
 0x343   : > { %v1600_v61 = vunpack.i.h.bf16 %v1598_v39  ;;  %v1599_v62 = vunpack.i.l.bf16 %v1598_v39  ;;  %v1109_v63 = vsel %vm461_vm12, %v1585_v57, %v1550_v37  ;;  %v1110_v35 = vsel %vm461_vm12, %v1550_v37, %v1584_v51  ;;  %1157 = vmatpush1.bf16.msra.mxu1 %v1144_v46  ;;  %1188 = vmatprep.mubr.bf16.mxu1 %v1727_v28 }
 0x344   : > { %v1603_v53 = vpop.permute.xlu1 %1602 }
 0x345   : > { %v1119_v0 = vsel %vm472_vm11, %v1600_v61, %v1555_v34  ;;  %v1120_v38 = vsel %vm472_vm11, %v1555_v34, %v1599_v62  ;;  %v1605_v1 = vunpack.i.h.bf16 %v1603_v53  ;;  %v1604_v3 = vunpack.i.l.bf16 %v1603_v53 }
 0x346   : > { %v1131_v4 = vpop.permute.xlu0 %1130  ;;  %v1143_v44 = vsel %vm491_vm8, %v1110_v35, %v1120_v38  ;;  %v1142_v60 = vsel %vm491_vm8, %v1109_v63, %v1119_v0 }
 0x347   : > { %v1133_v24 = vsel %vm486_vm13, %v1605_v1, %v1131_v4  ;;  %v1147_v10 = vpack.c.bf16 %v1143_v44, %v1141_v5  ;;  %v1146_v29 = vpack.c.bf16 %v1142_v60, %v1140_v7  ;;  %v1132_v28 = vsel %vm486_vm13, %v1604_v3, %v1605_v1 }
 0x348   : > { %v1149_v27 = vpack.c.bf16 %v1133_v24, %v1133_v24  ;;  %v1148_v30 = vpack.c.bf16 %v1132_v28, %v1132_v28 }
 0x349   : > { %1158 = vmatprep.subr.bf16.mxu1 %v1147_v10 }
 0x34a   : > { %1159 = vmatpush1.bf16.msra.mxu1 %v1146_v29  ;;  %v1151_v20 = vsel %vm515_vm14, %v1148_v30, 0 }
 0x34b   : > { %1311 = vmatprep.subr.msk.bf16.mxu1 %vm515_vm14, %v1149_v27 }
 0x34e   : > { %1161 = vmatpush1.bf16.msra.mxu1 %v1151_v20 }
 0x351   : > { %1312 = vmatmul.mubr.msk.bf16.vlgmr.msra.gmra.mrb[4].mxu1 %vm2447_vm1, %v304_v22 }
 0x355   : > { %v758_v40 = vpop.permute.xlu1 %757 }
 0x415   : > { %v803_v33 = vpop.f32.mrb[0].mxu1 }
 0x416   : > { %v804_v2 = vadd.f32 %v803_v33, %v758_v40  ;;  %v805_v26 = vpop.f32.mrb[1].mxu1 }
 0x417   : > { %v806_v13 = vadd.f32 %v805_v26, %v758_v40  ;;  %v807_v41 = vpop.f32.mrb[2].mxu1 }
 0x418   : > { %v810_v55 = vadd.f32 %v804_v2, %v2066_v12  ;;  %v808_v45 = vpop.f32.mrb[3].mxu1 }
 0x419   : > { %v811_v47 = vadd.f32 %v806_v13, %v2058_v15 }
 0x41a   : > { %v812_v11 = vmax.f32 %v810_v55, 0.0 }
 0x41b   : > { %v813_v48 = vmax.f32 %v811_v47, 0.0 }
 0x41d   : > { %v816_v50 = vcombine.low %v812_v11, %v813_v48 }
 0x41f   : > { %818 = vst [vmem:[%s297_s20] sm:$0xff] %v816_v50 }
 0x424   : > { %v1190_v23 = vpop.f32.mrb[4].mxu1 }
 0x425   : > { %v1191_v49 = vadd.f32 %v1190_v23, %v758_v40  ;;  %v1192_v16 = vpop.f32.mrb[5].mxu1 }
 0x426   : > { %v1193_v18 = vadd.f32 %v1192_v16, %v758_v40  ;;  %v1194_v52 = vpop.f32.mrb[6].mxu1 }
 0x427   : > { %v1197_v12 = vadd.f32 %v1191_v49, %v2111_v31  ;;  %v1195_v9 = vpop.f32.mrb[7].mxu1 }
 0x428   : > { %v1198_v14 = vadd.f32 %v1193_v18, %v2117_v36 }
 0x429   : > { %v1199_v15 = vmax.f32 %v1197_v12, 0.0 }
 0x42a   : > { %v1200_v8 = vmax.f32 %v1198_v14, 0.0 }
 0x42c   : > { %v1203_v17 = vcombine.low %v1199_v15, %v1200_v8 }
 0x42e   : > { %1313 = vst [vmem:[%s297_s20 + $0x8] sm:$0xff] %v1203_v17 }
 0x42f   : > { %1656 = shalt.err (!%p1653_p2)
}
 0x430   : > { %s1657_s18 = scalar_lea.hbm %s2382_s8, 256  ;;  %s1661_s20 = scalar_lea.hbm %s2433_s7, 512 }
 0x431   : > { %p1658_p4 = scmp.ne.s32.totalorder %s2382_s8, %s1657_s18  ;;  %p1662_p9 = scmp.lt.u32.totalorder %s2382_s8, %s2433_s7 }
 0x432   : > { %p1663_p1 = scmp.lt.u32.totalorder %s1661_s20, %s1657_s18  ;;  %p1665_p6 = scmp.lt.u32.totalorder %s1657_s18, %s2382_s8 }
 0x433   : > { %p1659_p5 = pnand %p1658_p4, %p2448_p11 }
 0x434   : > { %p1664_p3 = por %p1663_p1, %p1662_p9 }
 0x435   : > { %p1660_p7 = pneg %p1659_p5 }
 0x436   : > { %p1666_p12 = por %p1665_p6, %p1664_p3 }
 0x438   : > { %p1667_p13 = pnand %p1666_p12, %p1660_p7 }
 0x43a   : > { %1670 = shalt.err (!%p1667_p13)
}
 0x43b   : > { %s1730_s21 = smov 128   ;;  %s1731_s29 = smov 8  }
 0x43c   : > { %1327 = dma.vmem_to_hbm [thread:$0]  (%p2448_p11), %s2377_s22, 256, %s2382_s8, %s1208_s16, %s1730_s21, %s1730_s21, %s1731_s29  }
 0x43d PF: > { %s1237_s28 = sand.u32 1, %s1697_s24   ;;  %p2449_p8 = scmp.ne.s32.totalorder %s2442_s13, 0 }
 0x43e   : > { %p2450_p10 = scmp.ge.s32.totalorder %s1709_s27, 2  ;;  %s1238_s9 = scalar_lea.sflag [#allocation4], %s1237_s28 }
 0x440   : > { %p1334_p0 = pnand %p2450_p10, %p2449_p8 }
 0x442   : > { %1692 = dma.done.wait (!%p1334_p0), %s1238_s9, 256  }
 0x443   : > { %1694 = vsyncadd (!%p1334_p0), %s1238_s9, 4294967040  ;;  %p20_p2 = scmp.ge.s32.totalorder %s1797_s30, 4   ;;  %s2451_s24 = smov %s1701_s25 }
 0x444   : > { %s2452_s25 = smov %s1705_s26  ;;  %s2453_s26 = smov %s1809_s10 }
 0x445   : > { %s2454_s27 = smov %s1797_s30  ;;  %22 = sbr.rel (!%p20_p2) target bundleno = 5 (0x5), region = 95 }
 0x44c   :  { %1243 = vsyncpa [#allocation3], 1 }
 0x44d   :  { %1245 = vsyncpa [#allocation3 + $0x1], 1 }
 0x44e   :  { %1246 = vsyncpa [#allocation4], 1 }
 0x44f   :  { %1248 = vsyncpa [#allocation4 + $0x1], 1 }

</bundles_post_ra>
